<compile_context>
chip_gen: v5e
topology: v5e:2x2
jax: 0.10.0
libtpu: 0.0.40
codegen_flags: <defaults>
</compile_context>

<pallas_src>
import jax
import jax.numpy as jnp
from jax.experimental import pallas as pl
from jax.experimental.pallas import tpu as pltpu

# ----------------------- model configuration (small, self-consistent) --------
BATCH = 2
SEQ = 8
INPUT_SIZE = 16
HIDDEN = 32
NUM_LAYERS = 2
OUTPUT_SHAPE = (2, 5)            # output_size = 10
OUTPUT_SIZE = 10
OUT_PAD = 128                    # lane-dense padded output width


# ----------------------------- Pallas kernel ---------------------------------
def lstm_net_kernel(x_ref, w_ih0_ref, w_hh0_ref, w_comb_ref, b_ref,
                    w_out_ref, b_out_ref, o_ref):
    """Single-invocation stacked LSTM + ReLU + Linear head.

    x_ref:      (SEQ*BATCH, INPUT_SIZE)  time-major flattened input
    w_ih0_ref:  (INPUT_SIZE, 4H)         layer-0 input->gates weights
    w_hh0_ref:  (HIDDEN, 4H)             layer-0 hidden->gates weights
    w_comb_ref: (NUM_LAYERS-1, 2H, 4H)   fused [w_ih; w_hh] for layers >= 1
    b_ref:      (NUM_LAYERS, 1, 4H)      combined bias (b_ih + b_hh)
    w_out_ref:  (HIDDEN, OUT_PAD)        Linear weight (transposed, lane-padded)
    b_out_ref:  (1, OUT_PAD)             Linear bias (lane-padded)
    o_ref:      (BATCH, OUT_PAD)         lane-dense output
    """
    H = HIDDEN
    B = BATCH

    # Hoisted layer-0 input projection: no recurrent dependence, so one
    # well-shaped (SEQ*B, I) @ (I, 4H) matmul covers every time step.
    gates_x0 = jnp.dot(x_ref[...], w_ih0_ref[...],
                       preferred_element_type=jnp.float32)        # (T*B, 4H)

    w_hh0 = w_hh0_ref[...]
    w_combs = [w_comb_ref[l] for l in range(NUM_LAYERS - 1)]
    biases = [b_ref[l] for l in range(NUM_LAYERS)]

    h = [jnp.zeros((B, H), jnp.float32) for _ in range(NUM_LAYERS)]
    c = [jnp.zeros((B, H), jnp.float32) for _ in range(NUM_LAYERS)]

    def cell(gates, c_prev):
        # PyTorch gate order: i, f, g, o
        i_g = jax.nn.sigmoid(gates[:, 0 * H:1 * H])
        f_g = jax.nn.sigmoid(gates[:, 1 * H:2 * H])
        g_g = jnp.tanh(gates[:, 2 * H:3 * H])
        o_g = jax.nn.sigmoid(gates[:, 3 * H:4 * H])
        c_new = f_g * c_prev + i_g * g_g
        h_new = o_g * jnp.tanh(c_new)
        return h_new, c_new

    # SEQ is small and static -> fully unrolled recurrence inside one kernel.
    for t in range(SEQ):
        # Layer 0: precomputed input gates + one recurrent matmul.
        gates = (gates_x0[t * B:(t + 1) * B, :]
                 + jnp.dot(h[0], w_hh0, preferred_element_type=jnp.float32)
                 + biases[0])
        h[0], c[0] = cell(gates, c[0])
        inp = h[0]
        # Stacked layers: single fused [inp, h_prev] @ [w_ih; w_hh] matmul.
        for l in range(1, NUM_LAYERS):
            xh = jnp.concatenate([inp, h[l]], axis=1)              # (B, 2H)
            gates = (jnp.dot(xh, w_combs[l - 1],
                             preferred_element_type=jnp.float32)
                     + biases[l])
            h[l], c[l] = cell(gates, c[l])
            inp = h[l]

    # Head: x = ReLU(hn[-1]); x = Linear(x)  -- lane-dense padded output.
    xh = jnp.maximum(h[NUM_LAYERS - 1], 0.0)
    o_ref[...] = (jnp.dot(xh, w_out_ref[...],
                          preferred_element_type=jnp.float32)
                  + b_out_ref[...])


# ------------------------------ wrapper ---------------------------------------
@jax.jit
def net_forward(x_btd, w_ih0, w_hh0, w_comb, b, w_out_pad, b_out_pad):
    """x_btd: (B, T, I) batch_first like PyTorch; returns (B, *OUTPUT_SHAPE)."""
    x_tbd = jnp.transpose(x_btd, (1, 0, 2))                 # (T, B, I) time-major
    x_flat = x_tbd.reshape(SEQ * BATCH, INPUT_SIZE)

    vmem = pl.BlockSpec(memory_space=pltpu.MemorySpace.VMEM)
    out = pl.pallas_call(
        lstm_net_kernel,
        out_shape=jax.ShapeDtypeStruct((BATCH, OUT_PAD), jnp.float32),
        in_specs=[vmem] * 7,
        out_specs=vmem,
    )(x_flat, w_ih0, w_hh0, w_comb, b, w_out_pad, b_out_pad)

    return out[:, :OUTPUT_SIZE].reshape((BATCH,) + OUTPUT_SHAPE)


# -------------------------- pure-JAX reference --------------------------------
def net_forward_ref(x_btd, w_ih0, w_hh0, w_comb, b, w_out_pad, b_out_pad):
    B = x_btd.shape[0]
    H = HIDDEN
    h = [jnp.zeros((B, H), jnp.float32) for _ in range(NUM_LAYERS)]
    c = [jnp.zeros((B, H), jnp.float32) for _ in range(NUM_LAYERS)]
    for t in range(SEQ):
        inp = x_btd[:, t, :]
        for layer in range(NUM_LAYERS):
            if layer == 0:
                gates = inp @ w_ih0 + h[0] @ w_hh0 + b[0]
            else:
                w_ih_l = w_comb[layer - 1][:H]
                w_hh_l = w_comb[layer - 1][H:]
                gates = inp @ w_ih_l + h[layer] @ w_hh_l + b[layer]
            i_g = jax.nn.sigmoid(gates[:, 0 * H:1 * H])
            f_g = jax.nn.sigmoid(gates[:, 1 * H:2 * H])
            g_g = jnp.tanh(gates[:, 2 * H:3 * H])
            o_g = jax.nn.sigmoid(gates[:, 3 * H:4 * H])
            c[layer] = f_g * c[layer] + i_g * g_g
            h[layer] = o_g * jnp.tanh(c[layer])
            inp = h[layer]
    x = jnp.maximum(h[-1], 0.0)
    out = x @ w_out_pad[:, :OUTPUT_SIZE] + b_out_pad[:, :OUTPUT_SIZE]
    return out.reshape((B,) + OUTPUT_SHAPE)


# ----------------------------- parameter init ---------------------------------
def init_params(key):
    ks = jax.random.split(key, 6)
    scale = 0.1
    w_ih0 = jax.random.normal(ks[0], (INPUT_SIZE, 4 * HIDDEN), jnp.float32) * scale
    w_hh0 = jax.random.normal(ks[1], (HIDDEN, 4 * HIDDEN), jnp.float32) * scale
    # Fused [w_ih; w_hh] per stacked layer >= 1 (in_dim == HIDDEN for those layers).
    w_comb = jax.random.normal(
        ks[2], (NUM_LAYERS - 1, 2 * HIDDEN, 4 * HIDDEN), jnp.float32) * scale
    b = jax.random.normal(ks[3], (NUM_LAYERS, 1, 4 * HIDDEN), jnp.float32) * scale
    w_out = jax.random.normal(ks[4], (HIDDEN, OUTPUT_SIZE), jnp.float32) * scale
    b_out = jax.random.normal(ks[5], (1, OUTPUT_SIZE), jnp.float32) * scale
    # Lane-dense padding of the output head (pad columns are zero).
    w_out_pad = jnp.zeros((HIDDEN, OUT_PAD), jnp.float32).at[:, :OUTPUT_SIZE].set(w_out)
    b_out_pad = jnp.zeros((1, OUT_PAD), jnp.float32).at[:, :OUTPUT_SIZE].set(b_out)
    return w_ih0, w_hh0, w_comb, b, w_out_pad, b_out_pad


if __name__ == "__main__":
    key = jax.random.PRNGKey(0)
    kx, kp = jax.random.split(key)
    x = jax.random.normal(kx, (BATCH, SEQ, INPUT_SIZE), jnp.float32)
    params = init_params(kp)

    out = net_forward(x, *params)
    out = jax.block_until_ready(out)

    ref = net_forward_ref(x, *params)
    assert out.shape == (BATCH,) + OUTPUT_SHAPE, out.shape
    assert jnp.allclose(out, ref, atol=1e-5, rtol=1e-5), (out, ref)

    print("KERNEL_OK")
</pallas_src>

<mosaic_0001>
module attributes {stable_mosaic.version = 11 : i64} {
  func.func @lstm_net_kernel(%arg0: memref<16x16xf32, #tpu.memory_space<vmem>>, %arg1: memref<16x128xf32, #tpu.memory_space<vmem>>, %arg2: memref<32x128xf32, #tpu.memory_space<vmem>>, %arg3: memref<1x64x128xf32, #tpu.memory_space<vmem>>, %arg4: memref<2x1x128xf32, #tpu.memory_space<vmem>>, %arg5: memref<32x128xf32, #tpu.memory_space<vmem>>, %arg6: memref<1x128xf32, #tpu.memory_space<vmem>>, %arg7: memref<2x128xf32, #tpu.memory_space<vmem>>) attributes {dimension_semantics = [], scalar_prefetch = 0 : i64, scratch_operands = 0 : i64, tpu.core_type = #tpu.core_type<tc>} {
    %c0 = arith.constant 0 : index
    %c0_0 = arith.constant 0 : index
    %0 = vector.load %arg0[%c0, %c0_0] : memref<16x16xf32, #tpu.memory_space<vmem>>, vector<16x16xf32>
    %c0_1 = arith.constant 0 : index
    %c0_2 = arith.constant 0 : index
    %1 = vector.load %arg1[%c0_1, %c0_2] : memref<16x128xf32, #tpu.memory_space<vmem>>, vector<16x128xf32>
    %cst = arith.constant dense<0.000000e+00> : vector<16x128xf32>
    %2 = tpu.matmul %0, %1, %cst {dimension_numbers = #tpu.dot_dimension_numbers<[1], [0], [0], [1], [0, 0, 1, 1], [], []>} : vector<16x16xf32>, vector<16x128xf32>, vector<16x128xf32> -> vector<16x128xf32>
    %c0_3 = arith.constant 0 : index
    %c0_4 = arith.constant 0 : index
    %3 = vector.load %arg2[%c0_3, %c0_4] : memref<32x128xf32, #tpu.memory_space<vmem>>, vector<32x128xf32>
    %c0_5 = arith.constant 0 : index
    %c0_6 = arith.constant 0 : index
    %c0_7 = arith.constant 0 : index
    %4 = vector.load %arg3[%c0_5, %c0_6, %c0_7] : memref<1x64x128xf32, #tpu.memory_space<vmem>>, vector<1x64x128xf32>
    %5 = vector.shape_cast %4 : vector<1x64x128xf32> to vector<64x128xf32>
    %c0_8 = arith.constant 0 : index
    %c0_9 = arith.constant 0 : index
    %c0_10 = arith.constant 0 : index
    %6 = vector.load %arg4[%c0_8, %c0_9, %c0_10] : memref<2x1x128xf32, #tpu.memory_space<vmem>>, vector<1x1x128xf32>
    %7 = vector.shape_cast %6 : vector<1x1x128xf32> to vector<1x128xf32>
    %c1 = arith.constant 1 : index
    %c0_11 = arith.constant 0 : index
    %c0_12 = arith.constant 0 : index
    %8 = vector.load %arg4[%c1, %c0_11, %c0_12] : memref<2x1x128xf32, #tpu.memory_space<vmem>>, vector<1x1x128xf32>
    %9 = vector.shape_cast %8 : vector<1x1x128xf32> to vector<1x128xf32>
    %cst_13 = arith.constant 0.000000e+00 : f32
    %10 = vector.broadcast %cst_13 : f32 to vector<2x32xf32>
    %cst_14 = arith.constant 0.000000e+00 : f32
    %11 = vector.broadcast %cst_14 : f32 to vector<2x32xf32>
    %cst_15 = arith.constant 0.000000e+00 : f32
    %12 = vector.broadcast %cst_15 : f32 to vector<2x32xf32>
    %cst_16 = arith.constant 0.000000e+00 : f32
    %13 = vector.broadcast %cst_16 : f32 to vector<2x32xf32>
    %14 = vector.extract_strided_slice %2 {offsets = [0, 0], sizes = [2, 128], strides = [1, 1]} : vector<16x128xf32> to vector<2x128xf32>
    %cst_17 = arith.constant dense<0.000000e+00> : vector<2x128xf32>
    %15 = tpu.matmul %10, %3, %cst_17 {dimension_numbers = #tpu.dot_dimension_numbers<[1], [0], [0], [1], [0, 0, 1, 1], [], []>} : vector<2x32xf32>, vector<32x128xf32>, vector<2x128xf32> -> vector<2x128xf32>
    %16 = arith.addf %14, %15 : vector<2x128xf32>
    %17 = vector.broadcast %7 : vector<1x128xf32> to vector<2x128xf32>
    %18 = arith.addf %16, %17 : vector<2x128xf32>
    %19 = vector.extract_strided_slice %18 {offsets = [0, 0], sizes = [2, 32], strides = [1, 1]} : vector<2x128xf32> to vector<2x32xf32>
    %20 = arith.negf %19 : vector<2x32xf32>
    %21 = math.exp %20 : vector<2x32xf32>
    %cst_18 = arith.constant 1.000000e+00 : f32
    %22 = vector.broadcast %cst_18 : f32 to vector<2x32xf32>
    %23 = arith.addf %22, %21 : vector<2x32xf32>
    %24 = arith.divf %22, %23 : vector<2x32xf32>
    %25 = vector.extract_strided_slice %18 {offsets = [0, 32], sizes = [2, 32], strides = [1, 1]} : vector<2x128xf32> to vector<2x32xf32>
    %26 = arith.negf %25 : vector<2x32xf32>
    %27 = math.exp %26 : vector<2x32xf32>
    %cst_19 = arith.constant 1.000000e+00 : f32
    %28 = vector.broadcast %cst_19 : f32 to vector<2x32xf32>
    %29 = arith.addf %28, %27 : vector<2x32xf32>
    %30 = arith.divf %28, %29 : vector<2x32xf32>
    %31 = vector.extract_strided_slice %18 {offsets = [0, 64], sizes = [2, 32], strides = [1, 1]} : vector<2x128xf32> to vector<2x32xf32>
    %32 = math.tanh %31 : vector<2x32xf32>
    %33 = vector.extract_strided_slice %18 {offsets = [0, 96], sizes = [2, 32], strides = [1, 1]} : vector<2x128xf32> to vector<2x32xf32>
    %34 = arith.negf %33 : vector<2x32xf32>
    %35 = math.exp %34 : vector<2x32xf32>
    %cst_20 = arith.constant 1.000000e+00 : f32
    %36 = vector.broadcast %cst_20 : f32 to vector<2x32xf32>
    %37 = arith.addf %36, %35 : vector<2x32xf32>
    %38 = arith.divf %36, %37 : vector<2x32xf32>
    %39 = arith.mulf %30, %12 : vector<2x32xf32>
    %40 = arith.mulf %24, %32 : vector<2x32xf32>
    %41 = arith.addf %39, %40 : vector<2x32xf32>
    %42 = math.tanh %41 : vector<2x32xf32>
    %43 = arith.mulf %38, %42 : vector<2x32xf32>
    %44 = tpu.concatenate %43, %11 in 1 : vector<2x32xf32>, vector<2x32xf32> -> vector<2x64xf32>
    %cst_21 = arith.constant dense<0.000000e+00> : vector<2x128xf32>
    %45 = tpu.matmul %44, %5, %cst_21 {dimension_numbers = #tpu.dot_dimension_numbers<[1], [0], [0], [1], [0, 0, 1, 1], [], []>} : vector<2x64xf32>, vector<64x128xf32>, vector<2x128xf32> -> vector<2x128xf32>
    %46 = vector.broadcast %9 : vector<1x128xf32> to vector<2x128xf32>
    %47 = arith.addf %45, %46 : vector<2x128xf32>
    %48 = vector.extract_strided_slice %47 {offsets = [0, 0], sizes = [2, 32], strides = [1, 1]} : vector<2x128xf32> to vector<2x32xf32>
    %49 = arith.negf %48 : vector<2x32xf32>
    %50 = math.exp %49 : vector<2x32xf32>
    %cst_22 = arith.constant 1.000000e+00 : f32
    %51 = vector.broadcast %cst_22 : f32 to vector<2x32xf32>
    %52 = arith.addf %51, %50 : vector<2x32xf32>
    %53 = arith.divf %51, %52 : vector<2x32xf32>
    %54 = vector.extract_strided_slice %47 {offsets = [0, 32], sizes = [2, 32], strides = [1, 1]} : vector<2x128xf32> to vector<2x32xf32>
    %55 = arith.negf %54 : vector<2x32xf32>
    %56 = math.exp %55 : vector<2x32xf32>
    %cst_23 = arith.constant 1.000000e+00 : f32
    %57 = vector.broadcast %cst_23 : f32 to vector<2x32xf32>
    %58 = arith.addf %57, %56 : vector<2x32xf32>
    %59 = arith.divf %57, %58 : vector<2x32xf32>
    %60 = vector.extract_strided_slice %47 {offsets = [0, 64], sizes = [2, 32], strides = [1, 1]} : vector<2x128xf32> to vector<2x32xf32>
    %61 = math.tanh %60 : vector<2x32xf32>
    %62 = vector.extract_strided_slice %47 {offsets = [0, 96], sizes = [2, 32], strides = [1, 1]} : vector<2x128xf32> to vector<2x32xf32>
    %63 = arith.negf %62 : vector<2x32xf32>
    %64 = math.exp %63 : vector<2x32xf32>
    %cst_24 = arith.constant 1.000000e+00 : f32
    %65 = vector.broadcast %cst_24 : f32 to vector<2x32xf32>
    %66 = arith.addf %65, %64 : vector<2x32xf32>
    %67 = arith.divf %65, %66 : vector<2x32xf32>
    %68 = arith.mulf %59, %13 : vector<2x32xf32>
    %69 = arith.mulf %53, %61 : vector<2x32xf32>
    %70 = arith.addf %68, %69 : vector<2x32xf32>
    %71 = math.tanh %70 : vector<2x32xf32>
    %72 = arith.mulf %67, %71 : vector<2x32xf32>
    %73 = vector.extract_strided_slice %2 {offsets = [2, 0], sizes = [2, 128], strides = [1, 1]} : vector<16x128xf32> to vector<2x128xf32>
    %cst_25 = arith.constant dense<0.000000e+00> : vector<2x128xf32>
    %74 = tpu.matmul %43, %3, %cst_25 {dimension_numbers = #tpu.dot_dimension_numbers<[1], [0], [0], [1], [0, 0, 1, 1], [], []>} : vector<2x32xf32>, vector<32x128xf32>, vector<2x128xf32> -> vector<2x128xf32>
    %75 = arith.addf %73, %74 : vector<2x128xf32>
    %76 = vector.broadcast %7 : vector<1x128xf32> to vector<2x128xf32>
    %77 = arith.addf %75, %76 : vector<2x128xf32>
    %78 = vector.extract_strided_slice %77 {offsets = [0, 0], sizes = [2, 32], strides = [1, 1]} : vector<2x128xf32> to vector<2x32xf32>
    %79 = arith.negf %78 : vector<2x32xf32>
    %80 = math.exp %79 : vector<2x32xf32>
    %cst_26 = arith.constant 1.000000e+00 : f32
    %81 = vector.broadcast %cst_26 : f32 to vector<2x32xf32>
    %82 = arith.addf %81, %80 : vector<2x32xf32>
    %83 = arith.divf %81, %82 : vector<2x32xf32>
    %84 = vector.extract_strided_slice %77 {offsets = [0, 32], sizes = [2, 32], strides = [1, 1]} : vector<2x128xf32> to vector<2x32xf32>
    %85 = arith.negf %84 : vector<2x32xf32>
    %86 = math.exp %85 : vector<2x32xf32>
    %cst_27 = arith.constant 1.000000e+00 : f32
    %87 = vector.broadcast %cst_27 : f32 to vector<2x32xf32>
    %88 = arith.addf %87, %86 : vector<2x32xf32>
    %89 = arith.divf %87, %88 : vector<2x32xf32>
    %90 = vector.extract_strided_slice %77 {offsets = [0, 64], sizes = [2, 32], strides = [1, 1]} : vector<2x128xf32> to vector<2x32xf32>
    %91 = math.tanh %90 : vector<2x32xf32>
    %92 = vector.extract_strided_slice %77 {offsets = [0, 96], sizes = [2, 32], strides = [1, 1]} : vector<2x128xf32> to vector<2x32xf32>
    %93 = arith.negf %92 : vector<2x32xf32>
    %94 = math.exp %93 : vector<2x32xf32>
    %cst_28 = arith.constant 1.000000e+00 : f32
    %95 = vector.broadcast %cst_28 : f32 to vector<2x32xf32>
    %96 = arith.addf %95, %94 : vector<2x32xf32>
    %97 = arith.divf %95, %96 : vector<2x32xf32>
    %98 = arith.mulf %89, %41 : vector<2x32xf32>
    %99 = arith.mulf %83, %91 : vector<2x32xf32>
    %100 = arith.addf %98, %99 : vector<2x32xf32>
    %101 = math.tanh %100 : vector<2x32xf32>
    %102 = arith.mulf %97, %101 : vector<2x32xf32>
    %103 = tpu.concatenate %102, %72 in 1 : vector<2x32xf32>, vector<2x32xf32> -> vector<2x64xf32>
    %cst_29 = arith.constant dense<0.000000e+00> : vector<2x128xf32>
    %104 = tpu.matmul %103, %5, %cst_29 {dimension_numbers = #tpu.dot_dimension_numbers<[1], [0], [0], [1], [0, 0, 1, 1], [], []>} : vector<2x64xf32>, vector<64x128xf32>, vector<2x128xf32> -> vector<2x128xf32>
    %105 = vector.broadcast %9 : vector<1x128xf32> to vector<2x128xf32>
    %106 = arith.addf %104, %105 : vector<2x128xf32>
    %107 = vector.extract_strided_slice %106 {offsets = [0, 0], sizes = [2, 32], strides = [1, 1]} : vector<2x128xf32> to vector<2x32xf32>
    %108 = arith.negf %107 : vector<2x32xf32>
    %109 = math.exp %108 : vector<2x32xf32>
    %cst_30 = arith.constant 1.000000e+00 : f32
    %110 = vector.broadcast %cst_30 : f32 to vector<2x32xf32>
    %111 = arith.addf %110, %109 : vector<2x32xf32>
    %112 = arith.divf %110, %111 : vector<2x32xf32>
    %113 = vector.extract_strided_slice %106 {offsets = [0, 32], sizes = [2, 32], strides = [1, 1]} : vector<2x128xf32> to vector<2x32xf32>
    %114 = arith.negf %113 : vector<2x32xf32>
    %115 = math.exp %114 : vector<2x32xf32>
    %cst_31 = arith.constant 1.000000e+00 : f32
    %116 = vector.broadcast %cst_31 : f32 to vector<2x32xf32>
    %117 = arith.addf %116, %115 : vector<2x32xf32>
    %118 = arith.divf %116, %117 : vector<2x32xf32>
    %119 = vector.extract_strided_slice %106 {offsets = [0, 64], sizes = [2, 32], strides = [1, 1]} : vector<2x128xf32> to vector<2x32xf32>
    %120 = math.tanh %119 : vector<2x32xf32>
    %121 = vector.extract_strided_slice %106 {offsets = [0, 96], sizes = [2, 32], strides = [1, 1]} : vector<2x128xf32> to vector<2x32xf32>
    %122 = arith.negf %121 : vector<2x32xf32>
    %123 = math.exp %122 : vector<2x32xf32>
    %cst_32 = arith.constant 1.000000e+00 : f32
    %124 = vector.broadcast %cst_32 : f32 to vector<2x32xf32>
    %125 = arith.addf %124, %123 : vector<2x32xf32>
    %126 = arith.divf %124, %125 : vector<2x32xf32>
    %127 = arith.mulf %118, %70 : vector<2x32xf32>
    %128 = arith.mulf %112, %120 : vector<2x32xf32>
    %129 = arith.addf %127, %128 : vector<2x32xf32>
    %130 = math.tanh %129 : vector<2x32xf32>
    %131 = arith.mulf %126, %130 : vector<2x32xf32>
    %132 = vector.extract_strided_slice %2 {offsets = [4, 0], sizes = [2, 128], strides = [1, 1]} : vector<16x128xf32> to vector<2x128xf32>
    %cst_33 = arith.constant dense<0.000000e+00> : vector<2x128xf32>
    %133 = tpu.matmul %102, %3, %cst_33 {dimension_numbers = #tpu.dot_dimension_numbers<[1], [0], [0], [1], [0, 0, 1, 1], [], []>} : vector<2x32xf32>, vector<32x128xf32>, vector<2x128xf32> -> vector<2x128xf32>
    %134 = arith.addf %132, %133 : vector<2x128xf32>
    %135 = vector.broadcast %7 : vector<1x128xf32> to vector<2x128xf32>
    %136 = arith.addf %134, %135 : vector<2x128xf32>
    %137 = vector.extract_strided_slice %136 {offsets = [0, 0], sizes = [2, 32], strides = [1, 1]} : vector<2x128xf32> to vector<2x32xf32>
    %138 = arith.negf %137 : vector<2x32xf32>
    %139 = math.exp %138 : vector<2x32xf32>
    %cst_34 = arith.constant 1.000000e+00 : f32
    %140 = vector.broadcast %cst_34 : f32 to vector<2x32xf32>
    %141 = arith.addf %140, %139 : vector<2x32xf32>
    %142 = arith.divf %140, %141 : vector<2x32xf32>
    %143 = vector.extract_strided_slice %136 {offsets = [0, 32], sizes = [2, 32], strides = [1, 1]} : vector<2x128xf32> to vector<2x32xf32>
    %144 = arith.negf %143 : vector<2x32xf32>
    %145 = math.exp %144 : vector<2x32xf32>
    %cst_35 = arith.constant 1.000000e+00 : f32
    %146 = vector.broadcast %cst_35 : f32 to vector<2x32xf32>
    %147 = arith.addf %146, %145 : vector<2x32xf32>
    %148 = arith.divf %146, %147 : vector<2x32xf32>
    %149 = vector.extract_strided_slice %136 {offsets = [0, 64], sizes = [2, 32], strides = [1, 1]} : vector<2x128xf32> to vector<2x32xf32>
    %150 = math.tanh %149 : vector<2x32xf32>
    %151 = vector.extract_strided_slice %136 {offsets = [0, 96], sizes = [2, 32], strides = [1, 1]} : vector<2x128xf32> to vector<2x32xf32>
    %152 = arith.negf %151 : vector<2x32xf32>
    %153 = math.exp %152 : vector<2x32xf32>
    %cst_36 = arith.constant 1.000000e+00 : f32
    %154 = vector.broadcast %cst_36 : f32 to vector<2x32xf32>
    %155 = arith.addf %154, %153 : vector<2x32xf32>
    %156 = arith.divf %154, %155 : vector<2x32xf32>
    %157 = arith.mulf %148, %100 : vector<2x32xf32>
    %158 = arith.mulf %142, %150 : vector<2x32xf32>
    %159 = arith.addf %157, %158 : vector<2x32xf32>
    %160 = math.tanh %159 : vector<2x32xf32>
    %161 = arith.mulf %156, %160 : vector<2x32xf32>
    %162 = tpu.concatenate %161, %131 in 1 : vector<2x32xf32>, vector<2x32xf32> -> vector<2x64xf32>
    %cst_37 = arith.constant dense<0.000000e+00> : vector<2x128xf32>
    %163 = tpu.matmul %162, %5, %cst_37 {dimension_numbers = #tpu.dot_dimension_numbers<[1], [0], [0], [1], [0, 0, 1, 1], [], []>} : vector<2x64xf32>, vector<64x128xf32>, vector<2x128xf32> -> vector<2x128xf32>
    %164 = vector.broadcast %9 : vector<1x128xf32> to vector<2x128xf32>
    %165 = arith.addf %163, %164 : vector<2x128xf32>
    %166 = vector.extract_strided_slice %165 {offsets = [0, 0], sizes = [2, 32], strides = [1, 1]} : vector<2x128xf32> to vector<2x32xf32>
    %167 = arith.negf %166 : vector<2x32xf32>
    %168 = math.exp %167 : vector<2x32xf32>
    %cst_38 = arith.constant 1.000000e+00 : f32
    %169 = vector.broadcast %cst_38 : f32 to vector<2x32xf32>
    %170 = arith.addf %169, %168 : vector<2x32xf32>
    %171 = arith.divf %169, %170 : vector<2x32xf32>
    %172 = vector.extract_strided_slice %165 {offsets = [0, 32], sizes = [2, 32], strides = [1, 1]} : vector<2x128xf32> to vector<2x32xf32>
    %173 = arith.negf %172 : vector<2x32xf32>
    %174 = math.exp %173 : vector<2x32xf32>
    %cst_39 = arith.constant 1.000000e+00 : f32
    %175 = vector.broadcast %cst_39 : f32 to vector<2x32xf32>
    %176 = arith.addf %175, %174 : vector<2x32xf32>
    %177 = arith.divf %175, %176 : vector<2x32xf32>
    %178 = vector.extract_strided_slice %165 {offsets = [0, 64], sizes = [2, 32], strides = [1, 1]} : vector<2x128xf32> to vector<2x32xf32>
    %179 = math.tanh %178 : vector<2x32xf32>
    %180 = vector.extract_strided_slice %165 {offsets = [0, 96], sizes = [2, 32], strides = [1, 1]} : vector<2x128xf32> to vector<2x32xf32>
    %181 = arith.negf %180 : vector<2x32xf32>
    %182 = math.exp %181 : vector<2x32xf32>
    %cst_40 = arith.constant 1.000000e+00 : f32
    %183 = vector.broadcast %cst_40 : f32 to vector<2x32xf32>
    %184 = arith.addf %183, %182 : vector<2x32xf32>
    %185 = arith.divf %183, %184 : vector<2x32xf32>
    %186 = arith.mulf %177, %129 : vector<2x32xf32>
    %187 = arith.mulf %171, %179 : vector<2x32xf32>
    %188 = arith.addf %186, %187 : vector<2x32xf32>
    %189 = math.tanh %188 : vector<2x32xf32>
    %190 = arith.mulf %185, %189 : vector<2x32xf32>
    %191 = vector.extract_strided_slice %2 {offsets = [6, 0], sizes = [2, 128], strides = [1, 1]} : vector<16x128xf32> to vector<2x128xf32>
    %cst_41 = arith.constant dense<0.000000e+00> : vector<2x128xf32>
    %192 = tpu.matmul %161, %3, %cst_41 {dimension_numbers = #tpu.dot_dimension_numbers<[1], [0], [0], [1], [0, 0, 1, 1], [], []>} : vector<2x32xf32>, vector<32x128xf32>, vector<2x128xf32> -> vector<2x128xf32>
    %193 = arith.addf %191, %192 : vector<2x128xf32>
    %194 = vector.broadcast %7 : vector<1x128xf32> to vector<2x128xf32>
    %195 = arith.addf %193, %194 : vector<2x128xf32>
    %196 = vector.extract_strided_slice %195 {offsets = [0, 0], sizes = [2, 32], strides = [1, 1]} : vector<2x128xf32> to vector<2x32xf32>
    %197 = arith.negf %196 : vector<2x32xf32>
    %198 = math.exp %197 : vector<2x32xf32>
    %cst_42 = arith.constant 1.000000e+00 : f32
    %199 = vector.broadcast %cst_42 : f32 to vector<2x32xf32>
    %200 = arith.addf %199, %198 : vector<2x32xf32>
    %201 = arith.divf %199, %200 : vector<2x32xf32>
    %202 = vector.extract_strided_slice %195 {offsets = [0, 32], sizes = [2, 32], strides = [1, 1]} : vector<2x128xf32> to vector<2x32xf32>
    %203 = arith.negf %202 : vector<2x32xf32>
    %204 = math.exp %203 : vector<2x32xf32>
    %cst_43 = arith.constant 1.000000e+00 : f32
    %205 = vector.broadcast %cst_43 : f32 to vector<2x32xf32>
    %206 = arith.addf %205, %204 : vector<2x32xf32>
    %207 = arith.divf %205, %206 : vector<2x32xf32>
    %208 = vector.extract_strided_slice %195 {offsets = [0, 64], sizes = [2, 32], strides = [1, 1]} : vector<2x128xf32> to vector<2x32xf32>
    %209 = math.tanh %208 : vector<2x32xf32>
    %210 = vector.extract_strided_slice %195 {offsets = [0, 96], sizes = [2, 32], strides = [1, 1]} : vector<2x128xf32> to vector<2x32xf32>
    %211 = arith.negf %210 : vector<2x32xf32>
    %212 = math.exp %211 : vector<2x32xf32>
    %cst_44 = arith.constant 1.000000e+00 : f32
    %213 = vector.broadcast %cst_44 : f32 to vector<2x32xf32>
    %214 = arith.addf %213, %212 : vector<2x32xf32>
    %215 = arith.divf %213, %214 : vector<2x32xf32>
    %216 = arith.mulf %207, %159 : vector<2x32xf32>
    %217 = arith.mulf %201, %209 : vector<2x32xf32>
    %218 = arith.addf %216, %217 : vector<2x32xf32>
    %219 = math.tanh %218 : vector<2x32xf32>
    %220 = arith.mulf %215, %219 : vector<2x32xf32>
    %221 = tpu.concatenate %220, %190 in 1 : vector<2x32xf32>, vector<2x32xf32> -> vector<2x64xf32>
    %cst_45 = arith.constant dense<0.000000e+00> : vector<2x128xf32>
    %222 = tpu.matmul %221, %5, %cst_45 {dimension_numbers = #tpu.dot_dimension_numbers<[1], [0], [0], [1], [0, 0, 1, 1], [], []>} : vector<2x64xf32>, vector<64x128xf32>, vector<2x128xf32> -> vector<2x128xf32>
    %223 = vector.broadcast %9 : vector<1x128xf32> to vector<2x128xf32>
    %224 = arith.addf %222, %223 : vector<2x128xf32>
    %225 = vector.extract_strided_slice %224 {offsets = [0, 0], sizes = [2, 32], strides = [1, 1]} : vector<2x128xf32> to vector<2x32xf32>
    %226 = arith.negf %225 : vector<2x32xf32>
    %227 = math.exp %226 : vector<2x32xf32>
    %cst_46 = arith.constant 1.000000e+00 : f32
    %228 = vector.broadcast %cst_46 : f32 to vector<2x32xf32>
    %229 = arith.addf %228, %227 : vector<2x32xf32>
    %230 = arith.divf %228, %229 : vector<2x32xf32>
    %231 = vector.extract_strided_slice %224 {offsets = [0, 32], sizes = [2, 32], strides = [1, 1]} : vector<2x128xf32> to vector<2x32xf32>
    %232 = arith.negf %231 : vector<2x32xf32>
    %233 = math.exp %232 : vector<2x32xf32>
    %cst_47 = arith.constant 1.000000e+00 : f32
    %234 = vector.broadcast %cst_47 : f32 to vector<2x32xf32>
    %235 = arith.addf %234, %233 : vector<2x32xf32>
    %236 = arith.divf %234, %235 : vector<2x32xf32>
    %237 = vector.extract_strided_slice %224 {offsets = [0, 64], sizes = [2, 32], strides = [1, 1]} : vector<2x128xf32> to vector<2x32xf32>
    %238 = math.tanh %237 : vector<2x32xf32>
    %239 = vector.extract_strided_slice %224 {offsets = [0, 96], sizes = [2, 32], strides = [1, 1]} : vector<2x128xf32> to vector<2x32xf32>
    %240 = arith.negf %239 : vector<2x32xf32>
    %241 = math.exp %240 : vector<2x32xf32>
    %cst_48 = arith.constant 1.000000e+00 : f32
    %242 = vector.broadcast %cst_48 : f32 to vector<2x32xf32>
    %243 = arith.addf %242, %241 : vector<2x32xf32>
    %244 = arith.divf %242, %243 : vector<2x32xf32>
    %245 = arith.mulf %236, %188 : vector<2x32xf32>
    %246 = arith.mulf %230, %238 : vector<2x32xf32>
    %247 = arith.addf %245, %246 : vector<2x32xf32>
    %248 = math.tanh %247 : vector<2x32xf32>
    %249 = arith.mulf %244, %248 : vector<2x32xf32>
    %250 = vector.extract_strided_slice %2 {offsets = [8, 0], sizes = [2, 128], strides = [1, 1]} : vector<16x128xf32> to vector<2x128xf32>
    %cst_49 = arith.constant dense<0.000000e+00> : vector<2x128xf32>
    %251 = tpu.matmul %220, %3, %cst_49 {dimension_numbers = #tpu.dot_dimension_numbers<[1], [0], [0], [1], [0, 0, 1, 1], [], []>} : vector<2x32xf32>, vector<32x128xf32>, vector<2x128xf32> -> vector<2x128xf32>
    %252 = arith.addf %250, %251 : vector<2x128xf32>
    %253 = vector.broadcast %7 : vector<1x128xf32> to vector<2x128xf32>
    %254 = arith.addf %252, %253 : vector<2x128xf32>
    %255 = vector.extract_strided_slice %254 {offsets = [0, 0], sizes = [2, 32], strides = [1, 1]} : vector<2x128xf32> to vector<2x32xf32>
    %256 = arith.negf %255 : vector<2x32xf32>
    %257 = math.exp %256 : vector<2x32xf32>
    %cst_50 = arith.constant 1.000000e+00 : f32
    %258 = vector.broadcast %cst_50 : f32 to vector<2x32xf32>
    %259 = arith.addf %258, %257 : vector<2x32xf32>
    %260 = arith.divf %258, %259 : vector<2x32xf32>
    %261 = vector.extract_strided_slice %254 {offsets = [0, 32], sizes = [2, 32], strides = [1, 1]} : vector<2x128xf32> to vector<2x32xf32>
    %262 = arith.negf %261 : vector<2x32xf32>
    %263 = math.exp %262 : vector<2x32xf32>
    %cst_51 = arith.constant 1.000000e+00 : f32
    %264 = vector.broadcast %cst_51 : f32 to vector<2x32xf32>
    %265 = arith.addf %264, %263 : vector<2x32xf32>
    %266 = arith.divf %264, %265 : vector<2x32xf32>
    %267 = vector.extract_strided_slice %254 {offsets = [0, 64], sizes = [2, 32], strides = [1, 1]} : vector<2x128xf32> to vector<2x32xf32>
    %268 = math.tanh %267 : vector<2x32xf32>
    %269 = vector.extract_strided_slice %254 {offsets = [0, 96], sizes = [2, 32], strides = [1, 1]} : vector<2x128xf32> to vector<2x32xf32>
    %270 = arith.negf %269 : vector<2x32xf32>
    %271 = math.exp %270 : vector<2x32xf32>
    %cst_52 = arith.constant 1.000000e+00 : f32
    %272 = vector.broadcast %cst_52 : f32 to vector<2x32xf32>
    %273 = arith.addf %272, %271 : vector<2x32xf32>
    %274 = arith.divf %272, %273 : vector<2x32xf32>
    %275 = arith.mulf %266, %218 : vector<2x32xf32>
    %276 = arith.mulf %260, %268 : vector<2x32xf32>
    %277 = arith.addf %275, %276 : vector<2x32xf32>
    %278 = math.tanh %277 : vector<2x32xf32>
    %279 = arith.mulf %274, %278 : vector<2x32xf32>
    %280 = tpu.concatenate %279, %249 in 1 : vector<2x32xf32>, vector<2x32xf32> -> vector<2x64xf32>
    %cst_53 = arith.constant dense<0.000000e+00> : vector<2x128xf32>
    %281 = tpu.matmul %280, %5, %cst_53 {dimension_numbers = #tpu.dot_dimension_numbers<[1], [0], [0], [1], [0, 0, 1, 1], [], []>} : vector<2x64xf32>, vector<64x128xf32>, vector<2x128xf32> -> vector<2x128xf32>
    %282 = vector.broadcast %9 : vector<1x128xf32> to vector<2x128xf32>
    %283 = arith.addf %281, %282 : vector<2x128xf32>
    %284 = vector.extract_strided_slice %283 {offsets = [0, 0], sizes = [2, 32], strides = [1, 1]} : vector<2x128xf32> to vector<2x32xf32>
    %285 = arith.negf %284 : vector<2x32xf32>
    %286 = math.exp %285 : vector<2x32xf32>
    %cst_54 = arith.constant 1.000000e+00 : f32
    %287 = vector.broadcast %cst_54 : f32 to vector<2x32xf32>
    %288 = arith.addf %287, %286 : vector<2x32xf32>
    %289 = arith.divf %287, %288 : vector<2x32xf32>
    %290 = vector.extract_strided_slice %283 {offsets = [0, 32], sizes = [2, 32], strides = [1, 1]} : vector<2x128xf32> to vector<2x32xf32>
    %291 = arith.negf %290 : vector<2x32xf32>
    %292 = math.exp %291 : vector<2x32xf32>
    %cst_55 = arith.constant 1.000000e+00 : f32
    %293 = vector.broadcast %cst_55 : f32 to vector<2x32xf32>
    %294 = arith.addf %293, %292 : vector<2x32xf32>
    %295 = arith.divf %293, %294 : vector<2x32xf32>
    %296 = vector.extract_strided_slice %283 {offsets = [0, 64], sizes = [2, 32], strides = [1, 1]} : vector<2x128xf32> to vector<2x32xf32>
    %297 = math.tanh %296 : vector<2x32xf32>
    %298 = vector.extract_strided_slice %283 {offsets = [0, 96], sizes = [2, 32], strides = [1, 1]} : vector<2x128xf32> to vector<2x32xf32>
    %299 = arith.negf %298 : vector<2x32xf32>
    %300 = math.exp %299 : vector<2x32xf32>
    %cst_56 = arith.constant 1.000000e+00 : f32
    %301 = vector.broadcast %cst_56 : f32 to vector<2x32xf32>
    %302 = arith.addf %301, %300 : vector<2x32xf32>
    %303 = arith.divf %301, %302 : vector<2x32xf32>
    %304 = arith.mulf %295, %247 : vector<2x32xf32>
    %305 = arith.mulf %289, %297 : vector<2x32xf32>
    %306 = arith.addf %304, %305 : vector<2x32xf32>
    %307 = math.tanh %306 : vector<2x32xf32>
    %308 = arith.mulf %303, %307 : vector<2x32xf32>
    %309 = vector.extract_strided_slice %2 {offsets = [10, 0], sizes = [2, 128], strides = [1, 1]} : vector<16x128xf32> to vector<2x128xf32>
    %cst_57 = arith.constant dense<0.000000e+00> : vector<2x128xf32>
    %310 = tpu.matmul %279, %3, %cst_57 {dimension_numbers = #tpu.dot_dimension_numbers<[1], [0], [0], [1], [0, 0, 1, 1], [], []>} : vector<2x32xf32>, vector<32x128xf32>, vector<2x128xf32> -> vector<2x128xf32>
    %311 = arith.addf %309, %310 : vector<2x128xf32>
    %312 = vector.broadcast %7 : vector<1x128xf32> to vector<2x128xf32>
    %313 = arith.addf %311, %312 : vector<2x128xf32>
    %314 = vector.extract_strided_slice %313 {offsets = [0, 0], sizes = [2, 32], strides = [1, 1]} : vector<2x128xf32> to vector<2x32xf32>
    %315 = arith.negf %314 : vector<2x32xf32>
    %316 = math.exp %315 : vector<2x32xf32>
    %cst_58 = arith.constant 1.000000e+00 : f32
    %317 = vector.broadcast %cst_58 : f32 to vector<2x32xf32>
    %318 = arith.addf %317, %316 : vector<2x32xf32>
    %319 = arith.divf %317, %318 : vector<2x32xf32>
    %320 = vector.extract_strided_slice %313 {offsets = [0, 32], sizes = [2, 32], strides = [1, 1]} : vector<2x128xf32> to vector<2x32xf32>
    %321 = arith.negf %320 : vector<2x32xf32>
    %322 = math.exp %321 : vector<2x32xf32>
    %cst_59 = arith.constant 1.000000e+00 : f32
    %323 = vector.broadcast %cst_59 : f32 to vector<2x32xf32>
    %324 = arith.addf %323, %322 : vector<2x32xf32>
    %325 = arith.divf %323, %324 : vector<2x32xf32>
    %326 = vector.extract_strided_slice %313 {offsets = [0, 64], sizes = [2, 32], strides = [1, 1]} : vector<2x128xf32> to vector<2x32xf32>
    %327 = math.tanh %326 : vector<2x32xf32>
    %328 = vector.extract_strided_slice %313 {offsets = [0, 96], sizes = [2, 32], strides = [1, 1]} : vector<2x128xf32> to vector<2x32xf32>
    %329 = arith.negf %328 : vector<2x32xf32>
    %330 = math.exp %329 : vector<2x32xf32>
    %cst_60 = arith.constant 1.000000e+00 : f32
    %331 = vector.broadcast %cst_60 : f32 to vector<2x32xf32>
    %332 = arith.addf %331, %330 : vector<2x32xf32>
    %333 = arith.divf %331, %332 : vector<2x32xf32>
    %334 = arith.mulf %325, %277 : vector<2x32xf32>
    %335 = arith.mulf %319, %327 : vector<2x32xf32>
    %336 = arith.addf %334, %335 : vector<2x32xf32>
    %337 = math.tanh %336 : vector<2x32xf32>
    %338 = arith.mulf %333, %337 : vector<2x32xf32>
    %339 = tpu.concatenate %338, %308 in 1 : vector<2x32xf32>, vector<2x32xf32> -> vector<2x64xf32>
    %cst_61 = arith.constant dense<0.000000e+00> : vector<2x128xf32>
    %340 = tpu.matmul %339, %5, %cst_61 {dimension_numbers = #tpu.dot_dimension_numbers<[1], [0], [0], [1], [0, 0, 1, 1], [], []>} : vector<2x64xf32>, vector<64x128xf32>, vector<2x128xf32> -> vector<2x128xf32>
    %341 = vector.broadcast %9 : vector<1x128xf32> to vector<2x128xf32>
    %342 = arith.addf %340, %341 : vector<2x128xf32>
    %343 = vector.extract_strided_slice %342 {offsets = [0, 0], sizes = [2, 32], strides = [1, 1]} : vector<2x128xf32> to vector<2x32xf32>
    %344 = arith.negf %343 : vector<2x32xf32>
    %345 = math.exp %344 : vector<2x32xf32>
    %cst_62 = arith.constant 1.000000e+00 : f32
    %346 = vector.broadcast %cst_62 : f32 to vector<2x32xf32>
    %347 = arith.addf %346, %345 : vector<2x32xf32>
    %348 = arith.divf %346, %347 : vector<2x32xf32>
    %349 = vector.extract_strided_slice %342 {offsets = [0, 32], sizes = [2, 32], strides = [1, 1]} : vector<2x128xf32> to vector<2x32xf32>
    %350 = arith.negf %349 : vector<2x32xf32>
    %351 = math.exp %350 : vector<2x32xf32>
    %cst_63 = arith.constant 1.000000e+00 : f32
    %352 = vector.broadcast %cst_63 : f32 to vector<2x32xf32>
    %353 = arith.addf %352, %351 : vector<2x32xf32>
    %354 = arith.divf %352, %353 : vector<2x32xf32>
    %355 = vector.extract_strided_slice %342 {offsets = [0, 64], sizes = [2, 32], strides = [1, 1]} : vector<2x128xf32> to vector<2x32xf32>
    %356 = math.tanh %355 : vector<2x32xf32>
    %357 = vector.extract_strided_slice %342 {offsets = [0, 96], sizes = [2, 32], strides = [1, 1]} : vector<2x128xf32> to vector<2x32xf32>
    %358 = arith.negf %357 : vector<2x32xf32>
    %359 = math.exp %358 : vector<2x32xf32>
    %cst_64 = arith.constant 1.000000e+00 : f32
    %360 = vector.broadcast %cst_64 : f32 to vector<2x32xf32>
    %361 = arith.addf %360, %359 : vector<2x32xf32>
    %362 = arith.divf %360, %361 : vector<2x32xf32>
    %363 = arith.mulf %354, %306 : vector<2x32xf32>
    %364 = arith.mulf %348, %356 : vector<2x32xf32>
    %365 = arith.addf %363, %364 : vector<2x32xf32>
    %366 = math.tanh %365 : vector<2x32xf32>
    %367 = arith.mulf %362, %366 : vector<2x32xf32>
    %368 = vector.extract_strided_slice %2 {offsets = [12, 0], sizes = [2, 128], strides = [1, 1]} : vector<16x128xf32> to vector<2x128xf32>
    %cst_65 = arith.constant dense<0.000000e+00> : vector<2x128xf32>
    %369 = tpu.matmul %338, %3, %cst_65 {dimension_numbers = #tpu.dot_dimension_numbers<[1], [0], [0], [1], [0, 0, 1, 1], [], []>} : vector<2x32xf32>, vector<32x128xf32>, vector<2x128xf32> -> vector<2x128xf32>
    %370 = arith.addf %368, %369 : vector<2x128xf32>
    %371 = vector.broadcast %7 : vector<1x128xf32> to vector<2x128xf32>
    %372 = arith.addf %370, %371 : vector<2x128xf32>
    %373 = vector.extract_strided_slice %372 {offsets = [0, 0], sizes = [2, 32], strides = [1, 1]} : vector<2x128xf32> to vector<2x32xf32>
    %374 = arith.negf %373 : vector<2x32xf32>
    %375 = math.exp %374 : vector<2x32xf32>
    %cst_66 = arith.constant 1.000000e+00 : f32
    %376 = vector.broadcast %cst_66 : f32 to vector<2x32xf32>
    %377 = arith.addf %376, %375 : vector<2x32xf32>
    %378 = arith.divf %376, %377 : vector<2x32xf32>
    %379 = vector.extract_strided_slice %372 {offsets = [0, 32], sizes = [2, 32], strides = [1, 1]} : vector<2x128xf32> to vector<2x32xf32>
    %380 = arith.negf %379 : vector<2x32xf32>
    %381 = math.exp %380 : vector<2x32xf32>
    %cst_67 = arith.constant 1.000000e+00 : f32
    %382 = vector.broadcast %cst_67 : f32 to vector<2x32xf32>
    %383 = arith.addf %382, %381 : vector<2x32xf32>
    %384 = arith.divf %382, %383 : vector<2x32xf32>
    %385 = vector.extract_strided_slice %372 {offsets = [0, 64], sizes = [2, 32], strides = [1, 1]} : vector<2x128xf32> to vector<2x32xf32>
    %386 = math.tanh %385 : vector<2x32xf32>
    %387 = vector.extract_strided_slice %372 {offsets = [0, 96], sizes = [2, 32], strides = [1, 1]} : vector<2x128xf32> to vector<2x32xf32>
    %388 = arith.negf %387 : vector<2x32xf32>
    %389 = math.exp %388 : vector<2x32xf32>
    %cst_68 = arith.constant 1.000000e+00 : f32
    %390 = vector.broadcast %cst_68 : f32 to vector<2x32xf32>
    %391 = arith.addf %390, %389 : vector<2x32xf32>
    %392 = arith.divf %390, %391 : vector<2x32xf32>
    %393 = arith.mulf %384, %336 : vector<2x32xf32>
    %394 = arith.mulf %378, %386 : vector<2x32xf32>
    %395 = arith.addf %393, %394 : vector<2x32xf32>
    %396 = math.tanh %395 : vector<2x32xf32>
    %397 = arith.mulf %392, %396 : vector<2x32xf32>
    %398 = tpu.concatenate %397, %367 in 1 : vector<2x32xf32>, vector<2x32xf32> -> vector<2x64xf32>
    %cst_69 = arith.constant dense<0.000000e+00> : vector<2x128xf32>
    %399 = tpu.matmul %398, %5, %cst_69 {dimension_numbers = #tpu.dot_dimension_numbers<[1], [0], [0], [1], [0, 0, 1, 1], [], []>} : vector<2x64xf32>, vector<64x128xf32>, vector<2x128xf32> -> vector<2x128xf32>
    %400 = vector.broadcast %9 : vector<1x128xf32> to vector<2x128xf32>
    %401 = arith.addf %399, %400 : vector<2x128xf32>
    %402 = vector.extract_strided_slice %401 {offsets = [0, 0], sizes = [2, 32], strides = [1, 1]} : vector<2x128xf32> to vector<2x32xf32>
    %403 = arith.negf %402 : vector<2x32xf32>
    %404 = math.exp %403 : vector<2x32xf32>
    %cst_70 = arith.constant 1.000000e+00 : f32
    %405 = vector.broadcast %cst_70 : f32 to vector<2x32xf32>
    %406 = arith.addf %405, %404 : vector<2x32xf32>
    %407 = arith.divf %405, %406 : vector<2x32xf32>
    %408 = vector.extract_strided_slice %401 {offsets = [0, 32], sizes = [2, 32], strides = [1, 1]} : vector<2x128xf32> to vector<2x32xf32>
    %409 = arith.negf %408 : vector<2x32xf32>
    %410 = math.exp %409 : vector<2x32xf32>
    %cst_71 = arith.constant 1.000000e+00 : f32
    %411 = vector.broadcast %cst_71 : f32 to vector<2x32xf32>
    %412 = arith.addf %411, %410 : vector<2x32xf32>
    %413 = arith.divf %411, %412 : vector<2x32xf32>
    %414 = vector.extract_strided_slice %401 {offsets = [0, 64], sizes = [2, 32], strides = [1, 1]} : vector<2x128xf32> to vector<2x32xf32>
    %415 = math.tanh %414 : vector<2x32xf32>
    %416 = vector.extract_strided_slice %401 {offsets = [0, 96], sizes = [2, 32], strides = [1, 1]} : vector<2x128xf32> to vector<2x32xf32>
    %417 = arith.negf %416 : vector<2x32xf32>
    %418 = math.exp %417 : vector<2x32xf32>
    %cst_72 = arith.constant 1.000000e+00 : f32
    %419 = vector.broadcast %cst_72 : f32 to vector<2x32xf32>
    %420 = arith.addf %419, %418 : vector<2x32xf32>
    %421 = arith.divf %419, %420 : vector<2x32xf32>
    %422 = arith.mulf %413, %365 : vector<2x32xf32>
    %423 = arith.mulf %407, %415 : vector<2x32xf32>
    %424 = arith.addf %422, %423 : vector<2x32xf32>
    %425 = math.tanh %424 : vector<2x32xf32>
    %426 = arith.mulf %421, %425 : vector<2x32xf32>
    %427 = vector.extract_strided_slice %2 {offsets = [14, 0], sizes = [2, 128], strides = [1, 1]} : vector<16x128xf32> to vector<2x128xf32>
    %cst_73 = arith.constant dense<0.000000e+00> : vector<2x128xf32>
    %428 = tpu.matmul %397, %3, %cst_73 {dimension_numbers = #tpu.dot_dimension_numbers<[1], [0], [0], [1], [0, 0, 1, 1], [], []>} : vector<2x32xf32>, vector<32x128xf32>, vector<2x128xf32> -> vector<2x128xf32>
    %429 = arith.addf %427, %428 : vector<2x128xf32>
    %430 = vector.broadcast %7 : vector<1x128xf32> to vector<2x128xf32>
    %431 = arith.addf %429, %430 : vector<2x128xf32>
    %432 = vector.extract_strided_slice %431 {offsets = [0, 0], sizes = [2, 32], strides = [1, 1]} : vector<2x128xf32> to vector<2x32xf32>
    %433 = arith.negf %432 : vector<2x32xf32>
    %434 = math.exp %433 : vector<2x32xf32>
    %cst_74 = arith.constant 1.000000e+00 : f32
    %435 = vector.broadcast %cst_74 : f32 to vector<2x32xf32>
    %436 = arith.addf %435, %434 : vector<2x32xf32>
    %437 = arith.divf %435, %436 : vector<2x32xf32>
    %438 = vector.extract_strided_slice %431 {offsets = [0, 32], sizes = [2, 32], strides = [1, 1]} : vector<2x128xf32> to vector<2x32xf32>
    %439 = arith.negf %438 : vector<2x32xf32>
    %440 = math.exp %439 : vector<2x32xf32>
    %cst_75 = arith.constant 1.000000e+00 : f32
    %441 = vector.broadcast %cst_75 : f32 to vector<2x32xf32>
    %442 = arith.addf %441, %440 : vector<2x32xf32>
    %443 = arith.divf %441, %442 : vector<2x32xf32>
    %444 = vector.extract_strided_slice %431 {offsets = [0, 64], sizes = [2, 32], strides = [1, 1]} : vector<2x128xf32> to vector<2x32xf32>
    %445 = math.tanh %444 : vector<2x32xf32>
    %446 = vector.extract_strided_slice %431 {offsets = [0, 96], sizes = [2, 32], strides = [1, 1]} : vector<2x128xf32> to vector<2x32xf32>
    %447 = arith.negf %446 : vector<2x32xf32>
    %448 = math.exp %447 : vector<2x32xf32>
    %cst_76 = arith.constant 1.000000e+00 : f32
    %449 = vector.broadcast %cst_76 : f32 to vector<2x32xf32>
    %450 = arith.addf %449, %448 : vector<2x32xf32>
    %451 = arith.divf %449, %450 : vector<2x32xf32>
    %452 = arith.mulf %443, %395 : vector<2x32xf32>
    %453 = arith.mulf %437, %445 : vector<2x32xf32>
    %454 = arith.addf %452, %453 : vector<2x32xf32>
    %455 = math.tanh %454 : vector<2x32xf32>
    %456 = arith.mulf %451, %455 : vector<2x32xf32>
    %457 = tpu.concatenate %456, %426 in 1 : vector<2x32xf32>, vector<2x32xf32> -> vector<2x64xf32>
    %cst_77 = arith.constant dense<0.000000e+00> : vector<2x128xf32>
    %458 = tpu.matmul %457, %5, %cst_77 {dimension_numbers = #tpu.dot_dimension_numbers<[1], [0], [0], [1], [0, 0, 1, 1], [], []>} : vector<2x64xf32>, vector<64x128xf32>, vector<2x128xf32> -> vector<2x128xf32>
    %459 = vector.broadcast %9 : vector<1x128xf32> to vector<2x128xf32>
    %460 = arith.addf %458, %459 : vector<2x128xf32>
    %461 = vector.extract_strided_slice %460 {offsets = [0, 0], sizes = [2, 32], strides = [1, 1]} : vector<2x128xf32> to vector<2x32xf32>
    %462 = arith.negf %461 : vector<2x32xf32>
    %463 = math.exp %462 : vector<2x32xf32>
    %cst_78 = arith.constant 1.000000e+00 : f32
    %464 = vector.broadcast %cst_78 : f32 to vector<2x32xf32>
    %465 = arith.addf %464, %463 : vector<2x32xf32>
    %466 = arith.divf %464, %465 : vector<2x32xf32>
    %467 = vector.extract_strided_slice %460 {offsets = [0, 32], sizes = [2, 32], strides = [1, 1]} : vector<2x128xf32> to vector<2x32xf32>
    %468 = arith.negf %467 : vector<2x32xf32>
    %469 = math.exp %468 : vector<2x32xf32>
    %cst_79 = arith.constant 1.000000e+00 : f32
    %470 = vector.broadcast %cst_79 : f32 to vector<2x32xf32>
    %471 = arith.addf %470, %469 : vector<2x32xf32>
    %472 = arith.divf %470, %471 : vector<2x32xf32>
    %473 = vector.extract_strided_slice %460 {offsets = [0, 64], sizes = [2, 32], strides = [1, 1]} : vector<2x128xf32> to vector<2x32xf32>
    %474 = math.tanh %473 : vector<2x32xf32>
    %475 = vector.extract_strided_slice %460 {offsets = [0, 96], sizes = [2, 32], strides = [1, 1]} : vector<2x128xf32> to vector<2x32xf32>
    %476 = arith.negf %475 : vector<2x32xf32>
    %477 = math.exp %476 : vector<2x32xf32>
    %cst_80 = arith.constant 1.000000e+00 : f32
    %478 = vector.broadcast %cst_80 : f32 to vector<2x32xf32>
    %479 = arith.addf %478, %477 : vector<2x32xf32>
    %480 = arith.divf %478, %479 : vector<2x32xf32>
    %481 = arith.mulf %472, %424 : vector<2x32xf32>
    %482 = arith.mulf %466, %474 : vector<2x32xf32>
    %483 = arith.addf %481, %482 : vector<2x32xf32>
    %484 = math.tanh %483 : vector<2x32xf32>
    %485 = arith.mulf %480, %484 : vector<2x32xf32>
    %cst_81 = arith.constant 0.000000e+00 : f32
    %486 = vector.broadcast %cst_81 : f32 to vector<2x32xf32>
    %487 = arith.maximumf %485, %486 : vector<2x32xf32>
    %c0_82 = arith.constant 0 : index
    %c0_83 = arith.constant 0 : index
    %488 = vector.load %arg5[%c0_82, %c0_83] : memref<32x128xf32, #tpu.memory_space<vmem>>, vector<32x128xf32>
    %cst_84 = arith.constant dense<0.000000e+00> : vector<2x128xf32>
    %489 = tpu.matmul %487, %488, %cst_84 {dimension_numbers = #tpu.dot_dimension_numbers<[1], [0], [0], [1], [0, 0, 1, 1], [], []>} : vector<2x32xf32>, vector<32x128xf32>, vector<2x128xf32> -> vector<2x128xf32>
    %c0_85 = arith.constant 0 : index
    %c0_86 = arith.constant 0 : index
    %490 = vector.load %arg6[%c0_85, %c0_86] : memref<1x128xf32, #tpu.memory_space<vmem>>, vector<1x128xf32>
    %491 = vector.broadcast %490 : vector<1x128xf32> to vector<2x128xf32>
    %492 = arith.addf %489, %491 : vector<2x128xf32>
    %c0_87 = arith.constant 0 : index
    %c0_88 = arith.constant 0 : index
    %493 = vector.load %arg7[%c0_87, %c0_88] : memref<2x128xf32, #tpu.memory_space<vmem>>, vector<2x128xf32>
    tpu.vector_store %arg7[%c0_87, %c0_88], %492 {strides = array<i32>} : memref<2x128xf32, #tpu.memory_space<vmem>>, vector<2x128xf32>,
    return
  }
}

</mosaic_0001>

<bundles_post_ra>
// kernel: net_forward.1
= control target key start
LH: loop header
LB: loop body
LE: loop exit
PB: predicated region body
PF: predicated region fallthrough
CT: control target
= control target key end

     0   :  { %12 = vsyncpa [#allocation3], 0  ;;  %s1922_s0 = inlined_call_operand.vmem [shape: f32[16,16], index: 0, kind: input, shape index: {}]   ;;  %s1923_s1 = inlined_call_operand.hbm [shape: f32[16,128], index: 1, kind: input, shape index: {}]   ;;  %s1924_s2 = inlined_call_operand.vmem [shape: f32[32,128], index: 2, kind: input, shape index: {}]   ;;  %s1925_s3 = inlined_call_operand.hbm [shape: f32[1,64,128], index: 3, kind: input, shape index: {}]   ;;  %s1926_s4 = inlined_call_operand.vmem [shape: f32[2,1,128], index: 4, kind: input, shape index: {}]   ;;  %s1927_s5 = inlined_call_operand.hbm [shape: f32[32,128], index: 5, kind: input, shape index: {}]   ;;  %s1928_s6 = inlined_call_operand.vmem [shape: f32[1,128], index: 6, kind: input, shape index: {}]   ;;  %s1929_s7 = inlined_call_operand.vmem [shape: f32[2,128], index: 7, kind: output, shape index: {}]  }
   0x1   :  { %13 = vsyncpa [#allocation5], 0  ;;  %s35_s26 = sshll.u32 %s1925_s3, 4  ;;  %s1526_s27 = smov [#allocation4]   ;;  %s36_s26 = int_to_ptr.hbm [resolvable:$true] %s35_s26 }
   0x2   :  { %s37_s28 = sshll.u32 %s1526_s27, 4  ;;  %s20_s8 = sshll.u32 %s1923_s1, 4  ;;  %s38_s28 = int_to_ptr.vmem [resolvable:$true] %s37_s28  ;;  %s21_s8 = int_to_ptr.hbm [resolvable:$true] %s20_s8 }
   0x3   :  { %s1527_s9 = smov 128   ;;  %s1528_s10 = smov 8  }
   0x4   :  { %43 = dma.hbm_to_vmem [thread:$0]  %s36_s26, 1024, %s38_s28, [#allocation5], %s1527_s9, %s1527_s9, %s1528_s10  }
   0x5   :  { %s1529_s11 = smov [#allocation2]   ;;  %s50_s15 = sshll.u32 %s1927_s5, 4  ;;  %s51_s15 = int_to_ptr.hbm [resolvable:$true] %s50_s15 }
   0x6   :  { %s22_s12 = sshll.u32 %s1529_s11, 4  ;;  %s1530_s3 = smov [#allocation6]   ;;  %s23_s12 = int_to_ptr.vmem [resolvable:$true] %s22_s12 }
   0x7   :  { %28 = dma.hbm_to_vmem [thread:$0]  %s21_s8, 256, %s23_s12, [#allocation3], %s1527_s9, %s1527_s9, %s1528_s10  }
   0x8   :  { %s52_s16 = sshll.u32 %s1530_s3, 4  ;;  %s53_s16 = int_to_ptr.vmem [resolvable:$true] %s52_s16 }
   0x9   :  { %58 = dma.hbm_to_vmem [thread:$0]  %s51_s15, 512, %s53_s16, [#allocation5], %s1527_s9, %s1527_s9, %s1528_s10  }
   0xa   :  { %1522 = dma.done.wait [#allocation3], 256  }
   0xb   :  { %1523 = vsyncadd [#allocation3], 4294967040 }
   0xc   :  { %1524 = dma.done.wait [#allocation5], 1536  }
   0xd   :  { %1525 = vsyncadd [#allocation5], 4294965760  ;;  %v1586_v0 = vld [vmem:[%s1924_s2 + $0x18] sm:$0xff]  ;;  %v1591_v1 = vld [vmem:[%s1924_s2 + $0x10] sm:$0xff]  ;;  %vm77_vm0 = vcmask 130048   ;;  %v1531_v7 = vmov 0.0  }
   0xe   :  { %v76_v2 = vld [vmem:[#allocation2 + $0x8] sm:$0xff]  ;;  %138 = vmatpush.msra.mxu1 %v1586_v0  ;;  %v75_v4 = vld [vmem:[#allocation2] sm:$0xff]  ;;  %271 = vmatpush.msra.mxu3 %v1586_v0  ;;  %s1532_s26 = smov 64   ;;  %s1533_s27 = smov 32   ;;  %v1644_v35 = vld [vmem:[#allocation4 + $0x28] sm:$0xff]  ;;  %vm122_vm5 = vcmask 261120  }
   0xf   :  { %98 = vmatpush.msra.mxu0 %v76_v2  ;;  %v1597_v3 = vld [vmem:[%s1924_s2 + $0x8] sm:$0xff]  ;;  %v73_v5 = vld [vmem:[%s1922_s0] sm:$0xff]  ;;  %v1649_v36 = vld [vmem:[#allocation4 + $0x20] sm:$0xff]  ;;  %vm196_vm6 = vcmask 523264  }
  0x10   :  { %139 = vmatpush.msra.mxu1 %v1591_v1  ;;  %v1607_v6 = vld [vmem:[%s1924_s2] sm:$0xff]  ;;  %272 = vmatpush.msra.mxu3 %v1591_v1  ;;  %v1638_v33 = vld [vmem:[#allocation4 + $0x38] sm:$0xff]  ;;  %v1664_v39 = vld [vmem:[#allocation4 + $0x8] sm:$0xff] }
  0x11   :  { %99 = vmatpush.msra.mxu0 %v75_v4  ;;  %v1628_v9 = vld [vmem:[%s1926_s4] ss:$0 sm:$0xff]  ;;  %208 = vmatpush.msra.mxu2 %v1638_v33  ;;  %v1654_v37 = vld [vmem:[#allocation4 + $0x18] sm:$0xff]  ;;  %v1674_v42 = vld [vmem:[#allocation4] sm:$0xff] }
  0x12   :  { %1274 = vmatmul.msk.f32.vlgmr.msra.gmra.mxu0 %vm77_vm0, %v73_v5  ;;  %140 = vmatpush.msra.mxu1 %v1597_v3  ;;  %v1640_v34 = vld [vmem:[#allocation4 + $0x30] sm:$0xff] }
  0x13   :  { %273 = vmatpush.msra.mxu3 %v1597_v3  ;;  %346 = vmatpush.msrb.mxu0 %v1638_v33  ;;  %v1659_v38 = vld [vmem:[#allocation4 + $0x10] sm:$0xff] }
  0x14   :  { %141 = vmatpush.msra.mxu1 %v1607_v6  ;;  %209 = vmatpush.msra.mxu2 %v1640_v34  ;;  %v1707_v49 = vld [vmem:[%s1926_s4 + $0x1] ss:$0 sm:$0xff] }
  0x15   :  { %142 = vmatmul.f32.vlgmr.msra.gmra.mxu1 %v1531_v7  ;;  %274 = vmatpush.msra.mxu3 %v1607_v6 }
  0x16   :  { %412 = vmatpush.msrb.mxu1 %v1586_v0  ;;  %347 = vmatpush.msrb.mxu0 %v1640_v34 }
  0x17   :  { %487 = vmatpush.msrb.mxu3 %v1638_v33  ;;  %210 = vmatpush.msra.mxu2 %v1644_v35 }
  0x18   :  { %413 = vmatpush.msrb.mxu1 %v1591_v1  ;;  %348 = vmatpush.msrb.mxu0 %v1644_v35 }
  0x19   :  { %488 = vmatpush.msrb.mxu3 %v1640_v34  ;;  %211 = vmatpush.msra.mxu2 %v1649_v36 }
  0x1a   :  { %414 = vmatpush.msrb.mxu1 %v1597_v3  ;;  %349 = vmatpush.msrb.mxu0 %v1649_v36 }
  0x1b   :  { %489 = vmatpush.msrb.mxu3 %v1644_v35  ;;  %212 = vmatpush.msra.mxu2 %v1654_v37 }
  0x1c   :  { %415 = vmatpush.msrb.mxu1 %v1607_v6  ;;  %350 = vmatpush.msrb.mxu0 %v1654_v37 }
  0x1d   :  { %490 = vmatpush.msrb.mxu3 %v1649_v36  ;;  %213 = vmatpush.msra.mxu2 %v1659_v38 }
  0x1e   :  { %553 = vmatpush.msra.mxu1 %v1586_v0  ;;  %351 = vmatpush.msrb.mxu0 %v1659_v38 }
  0x1f   :  { %491 = vmatpush.msrb.mxu3 %v1654_v37  ;;  %214 = vmatpush.msra.mxu2 %v1664_v39 }
  0x20   :  { %554 = vmatpush.msra.mxu1 %v1591_v1  ;;  %352 = vmatpush.msrb.mxu0 %v1664_v39 }
  0x21   :  { %492 = vmatpush.msrb.mxu3 %v1659_v38  ;;  %215 = vmatpush.msra.mxu2 %v1674_v42 }
  0x22   :  { %555 = vmatpush.msra.mxu1 %v1597_v3  ;;  %353 = vmatpush.msrb.mxu0 %v1674_v42 }
  0x23   :  { %493 = vmatpush.msrb.mxu3 %v1664_v39  ;;  %628 = vmatpush.msrb.mxu2 %v1638_v33 }
  0x24   :  { %556 = vmatpush.msra.mxu1 %v1607_v6  ;;  %694 = vmatpush.msra.mxu0 %v1586_v0 }
  0x25   :  { %494 = vmatpush.msrb.mxu3 %v1674_v42  ;;  %629 = vmatpush.msrb.mxu2 %v1640_v34 }
  0x26   :  { %695 = vmatpush.msra.mxu0 %v1591_v1 }
  0x27   :  { %630 = vmatpush.msrb.mxu2 %v1644_v35 }
  0x28   :  { %696 = vmatpush.msra.mxu0 %v1597_v3 }
  0x29   :  { %631 = vmatpush.msrb.mxu2 %v1649_v36 }
  0x2a   :  { %697 = vmatpush.msra.mxu0 %v1607_v6 }
  0x2b   :  { %632 = vmatpush.msrb.mxu2 %v1654_v37 }
  0x2d   :  { %633 = vmatpush.msrb.mxu2 %v1659_v38 }
  0x2f   :  { %634 = vmatpush.msrb.mxu2 %v1664_v39 }
  0x31   :  { %635 = vmatpush.msrb.mxu2 %v1674_v42 }
  0x8f   :  { %v1623_v8 = vpop.f32.mrf.mxu0 }
  0x92   :  { %v143_v10 = vpop.f32.mrf.mxu1 }
  0x93   :  { %v146_v11 = vadd.f32 %v143_v10, %v1623_v8 }
  0x95   :  { %v150_v12 = vadd.f32 %v1628_v9, %v146_v11 }
  0x97   :  { %1320 = vtanh.f32 %v150_v12  ;;  %v1277_v14 = vmul.f32 -1.442695, %v150_v12 }
  0x99   :  { %1322 = vpow2.f32 %v1277_v14 }
  0x9d   :  { %v1321_v13 = vpop.eup %1320 }
  0x9e   :  { %173 = vrot.lane.b32.xlu0 %v1321_v13, %s1532_s26 }
  0x9f   :  { %v1323_v15 = vpop.eup %1322 }
  0xa0   :  { %v154_v16 = vadd.f32 1.0, %v1323_v15 }
  0xa2   :  { %1324 = vrcp.f32 %v154_v16  ;;  %v166_v22 = vand.u32 2147483648, %v154_v16  ;;  %vm160_vm2 = vweird.f32 %v154_v16  ;;  %v164_v23 = vand.u32 2147483647, %v154_v16 }
  0xa4   :  { %v167_v25 = vor.u32 1.1754944e-38, %v166_v22  ;;  %vm165_vm4 = vcmp.eq.f32.partialorder %v164_v23, 8.507059e+37 }
  0xa8   :  { %v1325_v17 = vpop.eup %1324 }
  0xa9   :  { %v156_v18 = vmul.f32 %v1325_v17, %v154_v16  ;;  %vm161_vm1 = vweird.f32 %v1325_v17 }
  0xaa   :  { %vm162_vm3 = vmor %vm160_vm2, %vm161_vm1 }
  0xab   :  { %v157_v19 = vsub.f32 1.0, %v156_v18 }
  0xad   :  { %v158_v20 = vmul.f32 %v1325_v17, %v157_v19 }
  0xaf   :  { %v159_v21 = vadd.f32 %v1325_v17, %v158_v20 }
  0xb1   :  { %v163_v24 = vsel %vm162_vm3, %v1325_v17, %v159_v21 }
  0xb2   :  { %v168_v27 = vsel %vm165_vm4, %v167_v25, %v163_v24 }
  0xb3   :  { %v171_v29 = vmul.f32 0.0, %v168_v27 }
 0x110   :  { %v174_v26 = vpop.permute.xlu0 %173 }
 0x111   :  { %v176_v28 = vmul.f32 %v174_v26, %v168_v27 }
 0x113   :  { %178 = vrot.lane.b32.xlu0 %v176_v28, %s1533_s27 }
 0x185   :  { %v179_v30 = vpop.permute.xlu0 %178 }
 0x186   :  { %v1634_v31 = vadd.f32 %v179_v30, %v171_v29 }
 0x188   :  { %1326 = vtanh.f32 %v1634_v31  ;;  %v305_v26 = vrot.slane %v1634_v31, 6 }
 0x18e   :  { %v1327_v32 = vpop.eup %1326 }
 0x18f   :  { %184 = vrot.lane.b32.xlu1 %v1327_v32, %s1532_s26 }
 0x201   :  { %v185_v40 = vpop.permute.xlu1 %184 }
 0x202   :  { %v187_v41 = vmul.f32 %v185_v40, %v168_v27 }
 0x204   :  { %189 = vrot.lane.b32.xlu1 %v187_v41, %s1533_s27 }
 0x276   :  { %v190_v43 = vpop.permute.xlu1 %189 }
 0x277   :  { %1280 = vmatmul.msk.f32.vlgmr.msra.gmra.mxu3 %vm122_vm5, %v190_v43  ;;  %v192_v44 = vsel %vm122_vm5, %v190_v43, 0.0 }
 0x278   :  { %1278 = vmatmul.msk.f32.vlgmr.msra.gmra.mxu2 %vm196_vm6, %v192_v44  ;;  %827 = vmatpush.msra.mxu3 %v1586_v0 }
 0x279   :  { %968 = vmatpush.msra.mxu2 %v1586_v0 }
 0x27a   :  { %828 = vmatpush.msra.mxu3 %v1591_v1 }
 0x27b   :  { %969 = vmatpush.msra.mxu2 %v1591_v1 }
 0x27c   :  { %829 = vmatpush.msra.mxu3 %v1597_v3 }
 0x27d   :  { %970 = vmatpush.msra.mxu2 %v1597_v3 }
 0x27e   :  { %830 = vmatpush.msra.mxu3 %v1607_v6 }
 0x27f   :  { %971 = vmatpush.msra.mxu2 %v1607_v6 }
 0x2fa   :  { %v276_v45 = vpop.f32.mrf.mxu3 }
 0x2fb   :  { %v280_v46 = vrot.slane %v276_v45, 6  ;;  %v217_v50 = vpop.f32.mrf.mxu2 }
 0x2fc   :  { %v218_v51 = vadd.f32 %v1707_v49, %v217_v50  ;;  %v74_v50 = vld [vmem:[%s1922_s0 + $0x8] sm:$0xff] }
 0x2fd   :  { %v282_v47 = vadd.f32 %v280_v46, %v1623_v8  ;;  %1275 = vmatmul.msk.f32.gmra.mxu0 %vm77_vm0, %v74_v50 }
 0x2fe   :  { %v1279_v55 = vmul.f32 -1.442695, %v218_v51 }
 0x2ff   :  { %v283_v48 = vadd.f32 %v1628_v9, %v282_v47 }
 0x301   :  { %1328 = vtanh.f32 %v283_v48  ;;  %v1281_v54 = vmul.f32 -1.442695, %v283_v48 }
 0x302   :  { %1330 = vtanh.f32 %v218_v51 }
 0x303   :  { %1332 = vpow2.f32 %v1281_v54 }
 0x304   :  { %1334 = vpow2.f32 %v1279_v55 }
 0x307   :  { %v1329_v52 = vpop.eup %1328 }
 0x308   :  { %309 = vrot.lane.b32.xlu2 %v1329_v52, %s1532_s26  ;;  %v1331_v53 = vpop.eup %1330 }
 0x309   :  { %v1333_v56 = vpop.eup %1332 }
 0x30a   :  { %v287_v57 = vadd.f32 1.0, %v1333_v56  ;;  %v1335_v58 = vpop.eup %1334 }
 0x30b   :  { %v223_v59 = vadd.f32 1.0, %v1335_v58 }
 0x30c   :  { %1336 = vrcp.f32 %v287_v57  ;;  %v299_v10 = vand.u32 2147483648, %v287_v57  ;;  %vm293_vm8 = vweird.f32 %v287_v57  ;;  %v297_v11 = vand.u32 2147483647, %v287_v57 }
 0x30d   :  { %1338 = vrcp.f32 %v223_v59  ;;  %v235_v19 = vand.u32 2147483648, %v223_v59  ;;  %vm229_vm12 = vweird.f32 %v223_v59  ;;  %v233_v20 = vand.u32 2147483647, %v223_v59 }
 0x30e   :  { %v300_v14 = vor.u32 1.1754944e-38, %v299_v10  ;;  %vm298_vm10 = vcmp.eq.f32.partialorder %v297_v11, 8.507059e+37 }
 0x30f   :  { %v236_v22 = vor.u32 1.1754944e-38, %v235_v19  ;;  %vm234_vm14 = vcmp.eq.f32.partialorder %v233_v20, 8.507059e+37 }
 0x310   :  { %242 = vrot.lane.b32.xlu2 %v1331_v53, %s1532_s26 }
 0x312   :  { %v1337_v60 = vpop.eup %1336 }
 0x313   :  { %v289_v61 = vmul.f32 %v1337_v60, %v287_v57  ;;  %v1339_v63 = vpop.eup %1338  ;;  %vm294_vm7 = vweird.f32 %v1337_v60 }
 0x314   :  { %v225_v4 = vmul.f32 %v1339_v63, %v223_v59  ;;  %vm295_vm9 = vmor %vm293_vm8, %vm294_vm7  ;;  %vm230_vm11 = vweird.f32 %v1339_v63 }
 0x315   :  { %v290_v62 = vsub.f32 1.0, %v289_v61  ;;  %vm231_vm13 = vmor %vm229_vm12, %vm230_vm11 }
 0x316   :  { %v226_v7 = vsub.f32 1.0, %v225_v4 }
 0x317   :  { %v291_v2 = vmul.f32 %v1337_v60, %v290_v62 }
 0x318   :  { %v227_v13 = vmul.f32 %v1339_v63, %v226_v7 }
 0x319   :  { %v292_v5 = vadd.f32 %v1337_v60, %v291_v2 }
 0x31a   :  { %v228_v18 = vadd.f32 %v1339_v63, %v227_v13 }
 0x31b   :  { %v296_v12 = vsel %vm295_vm9, %v1337_v60, %v292_v5 }
 0x31c   :  { %v301_v16 = vsel %vm298_vm10, %v300_v14, %v296_v12  ;;  %v232_v21 = vsel %vm231_vm13, %v1339_v63, %v228_v18 }
 0x31d   :  { %v237_v24 = vsel %vm234_vm14, %v236_v22, %v232_v21  ;;  %v307_v27 = vmul.f32 %v305_v26, %v301_v16 }
 0x31e   :  { %v240_v30 = vmul.f32 0.0, %v237_v24 }
 0x362   :  { %v310_v15 = vpop.permute.xlu2 %309 }
 0x363   :  { %v312_v17 = vmul.f32 %v310_v15, %v301_v16 }
 0x365   :  { %314 = vrot.lane.b32.xlu0 %v312_v17, %s1533_s27 }
 0x36a   :  { %v243_v23 = vpop.permute.xlu2 %242 }
 0x36b   :  { %v245_v25 = vmul.f32 %v243_v23, %v237_v24 }
 0x36d   :  { %247 = vrot.lane.b32.xlu1 %v245_v25, %s1533_s27 }
 0x37a   :  { %v1752_v61 = vpop.f32.mrf.mxu0 }
 0x3d7   :  { %v315_v28 = vpop.permute.xlu0 %314 }
 0x3d8   :  { %v1715_v29 = vadd.f32 %v315_v28, %v307_v27 }
 0x3da   :  { %1340 = vtanh.f32 %v1715_v29 }
 0x3df   :  { %v248_v32 = vpop.permute.xlu1 %247 }
 0x3e0   :  { %v1341_v40 = vpop.eup %1340  ;;  %v1718_v41 = vadd.f32 %v248_v32, %v240_v30 }
 0x3e1   :  { %320 = vrot.lane.b32.xlu2 %v1341_v40, %s1532_s26 }
 0x3e2   :  { %1342 = vtanh.f32 %v1718_v41 }
 0x3e8   :  { %v1343_v43 = vpop.eup %1342 }
 0x3e9   :  { %253 = vrot.lane.b32.xlu0 %v1343_v43, %s1532_s26 }
 0x43b   :  { %v321_v44 = vpop.permute.xlu2 %320 }
 0x43c   :  { %v323_v31 = vmul.f32 %v321_v44, %v301_v16 }
 0x43e   :  { %v395_v45 = vrot.slane %v323_v31, 2  ;;  %325 = vrot.lane.b32.xlu2 %v323_v31, %s1533_s27 }
 0x440   :  { %396 = vrot.lane.b32.xlu1 %v395_v45, %s1533_s27 }
 0x45b   :  { %v254_v46 = vpop.permute.xlu0 %253 }
 0x45c   :  { %v256_v47 = vmul.f32 %v254_v46, %v237_v24 }
 0x45e   :  { %v329_v48 = vrot.slane %v256_v47, 6  ;;  %v446_v47 = vrot.slane %v1715_v29, 6 }
 0x460   :  { %330 = vrot.lane.b32.xlu0 %v329_v48, %s1532_s26 }
 0x498   :  { %v326_v52 = vpop.permute.xlu2 %325 }
 0x4b2   :  { %v397_v51 = vpop.permute.xlu1 %396 }
 0x4b3   :  { %1284 = vmatmul.msk.f32.vlgmr.msrb.gmra.mxu1 %vm122_vm5, %v397_v51 }
 0x4b4   :  { %764 = vmatpush.msrb.mxu1 %v1638_v33 }
 0x4b6   :  { %765 = vmatpush.msrb.mxu1 %v1640_v34 }
 0x4b8   :  { %766 = vmatpush.msrb.mxu1 %v1644_v35 }
 0x4ba   :  { %767 = vmatpush.msrb.mxu1 %v1649_v36 }
 0x4bc   :  { %768 = vmatpush.msrb.mxu1 %v1654_v37 }
 0x4be   :  { %769 = vmatpush.msrb.mxu1 %v1659_v38 }
 0x4c0   :  { %770 = vmatpush.msrb.mxu1 %v1664_v39 }
 0x4c2   :  { %771 = vmatpush.msrb.mxu1 %v1674_v42 }
 0x4d2   :  { %v331_v53 = vpop.permute.xlu0 %330 }
 0x4d3   :  { %v333_v54 = vsel %vm122_vm5, %v326_v52, %v331_v53 }
 0x4d4   :  { %v335_v55 = vrot.slane %v333_v54, 2 }
 0x4d6   :  { %1282 = vmatmul.msk.f32.vlgmr.msrb.gmra.mxu0 %vm196_vm6, %v335_v55 }
 0x4d7   :  { %902 = vmatpush.msrb.mxu0 %v1638_v33 }
 0x4d9   :  { %903 = vmatpush.msrb.mxu0 %v1640_v34 }
 0x4db   :  { %904 = vmatpush.msrb.mxu0 %v1644_v35 }
 0x4dd   :  { %905 = vmatpush.msrb.mxu0 %v1649_v36 }
 0x4df   :  { %906 = vmatpush.msrb.mxu0 %v1654_v37 }
 0x4e1   :  { %907 = vmatpush.msrb.mxu0 %v1659_v38 }
 0x4e3   :  { %908 = vmatpush.msrb.mxu0 %v1664_v39 }
 0x4e5   :  { %909 = vmatpush.msrb.mxu0 %v1674_v42 }
 0x530   :  { %v417_v56 = vpop.f32.mrf.mxu1 }
 0x531   :  { %v421_v57 = vrot.slane %v417_v56, 4 }
 0x533   :  { %v423_v58 = vadd.f32 %v421_v57, %v1623_v8 }
 0x535   :  { %v424_v59 = vadd.f32 %v1628_v9, %v423_v58 }
 0x537   :  { %1344 = vtanh.f32 %v424_v59  ;;  %v1285_v4 = vmul.f32 -1.442695, %v424_v59 }
 0x53d   :  { %v1345_v60 = vpop.eup %1344 }
 0x53e   :  { %450 = vrot.lane.b32.xlu1 %v1345_v60, %s1532_s26 }
 0x553   :  { %v355_v62 = vpop.f32.mrf.mxu0 }
 0x554   :  { %v356_v63 = vadd.f32 %v1707_v49, %v355_v62 }
 0x556   :  { %1346 = vtanh.f32 %v356_v63  ;;  %v1283_v5 = vmul.f32 -1.442695, %v356_v63 }
 0x557   :  { %1348 = vpow2.f32 %v1285_v4 }
 0x558   :  { %1350 = vpow2.f32 %v1283_v5 }
 0x55c   :  { %v1347_v2 = vpop.eup %1346 }
 0x55d   :  { %380 = vrot.lane.b32.xlu2 %v1347_v2, %s1532_s26  ;;  %v1349_v7 = vpop.eup %1348 }
 0x55e   :  { %v428_v10 = vadd.f32 1.0, %v1349_v7  ;;  %v1351_v11 = vpop.eup %1350 }
 0x55f   :  { %v361_v12 = vadd.f32 1.0, %v1351_v11 }
 0x560   :  { %1352 = vrcp.f32 %v428_v10  ;;  %v440_v21 = vand.u32 2147483648, %v428_v10  ;;  %vm434_vm0 = vweird.f32 %v428_v10  ;;  %v438_v22 = vand.u32 2147483647, %v428_v10 }
 0x561   :  { %1354 = vrcp.f32 %v361_v12  ;;  %v373_v32 = vand.u32 2147483648, %v361_v12  ;;  %vm367_vm4 = vweird.f32 %v361_v12  ;;  %v371_v40 = vand.u32 2147483647, %v361_v12 }
 0x562   :  { %v441_v25 = vor.u32 1.1754944e-38, %v440_v21  ;;  %vm439_vm2 = vcmp.eq.f32.partialorder %v438_v22, 8.507059e+37 }
 0x563   :  { %v374_v44 = vor.u32 1.1754944e-38, %v373_v32  ;;  %vm372_vm8 = vcmp.eq.f32.partialorder %v371_v40, 8.507059e+37 }
 0x566   :  { %v1353_v13 = vpop.eup %1352 }
 0x567   :  { %v430_v14 = vmul.f32 %v1353_v13, %v428_v10  ;;  %v1355_v15 = vpop.eup %1354  ;;  %vm435_vm15 = vweird.f32 %v1353_v13 }
 0x568   :  { %v363_v17 = vmul.f32 %v1355_v15, %v361_v12  ;;  %vm436_vm1 = vmor %vm434_vm0, %vm435_vm15  ;;  %vm368_vm3 = vweird.f32 %v1355_v15 }
 0x569   :  { %v431_v16 = vsub.f32 1.0, %v430_v14  ;;  %vm369_vm7 = vmor %vm367_vm4, %vm368_vm3 }
 0x56a   :  { %v364_v19 = vsub.f32 1.0, %v363_v17 }
 0x56b   :  { %v432_v18 = vmul.f32 %v1353_v13, %v431_v16 }
 0x56c   :  { %v365_v23 = vmul.f32 %v1355_v15, %v364_v19 }
 0x56d   :  { %v433_v20 = vadd.f32 %v1353_v13, %v432_v18 }
 0x56e   :  { %v366_v28 = vadd.f32 %v1355_v15, %v365_v23 }
 0x56f   :  { %v437_v24 = vsel %vm436_vm1, %v1353_v13, %v433_v20 }
 0x570   :  { %v442_v27 = vsel %vm439_vm2, %v441_v25, %v437_v24  ;;  %v370_v43 = vsel %vm369_vm7, %v1355_v15, %v366_v28 }
 0x571   :  { %v375_v45 = vsel %vm372_vm8, %v374_v44, %v370_v43  ;;  %v448_v48 = vmul.f32 %v446_v47, %v442_v27 }
 0x572   :  { %v378_v52 = vmul.f32 %v375_v45, %v1718_v41 }
 0x5b0   :  { %v451_v26 = vpop.permute.xlu1 %450 }
 0x5b1   :  { %v453_v30 = vmul.f32 %v451_v26, %v442_v27 }
 0x5b3   :  { %455 = vrot.lane.b32.xlu0 %v453_v30, %s1533_s27 }
 0x5b7   :  { %v381_v31 = vpop.permute.xlu2 %380 }
 0x5b8   :  { %v383_v46 = vmul.f32 %v381_v31, %v375_v45 }
 0x5ba   :  { %385 = vrot.lane.b32.xlu1 %v383_v46, %s1533_s27 }
 0x625   :  { %v456_v50 = vpop.permute.xlu0 %455 }
 0x626   :  { %v1759_v51 = vadd.f32 %v456_v50, %v448_v48 }
 0x628   :  { %1356 = vtanh.f32 %v1759_v51 }
 0x62c   :  { %v386_v53 = vpop.permute.xlu1 %385 }
 0x62d   :  { %v1763_v54 = vadd.f32 %v386_v53, %v378_v52 }
 0x62e   :  { %v1357_v55 = vpop.eup %1356 }
 0x62f   :  { %1358 = vtanh.f32 %v1763_v54  ;;  %461 = vrot.lane.b32.xlu2 %v1357_v55, %s1532_s26  ;;  %v587_v55 = vrot.slane %v1759_v51, 6 }
 0x635   :  { %v1359_v56 = vpop.eup %1358 }
 0x636   :  { %391 = vrot.lane.b32.xlu0 %v1359_v56, %s1532_s26 }
 0x689   :  { %v462_v29 = vpop.permute.xlu2 %461 }
 0x68a   :  { %v464_v57 = vmul.f32 %v462_v29, %v442_v27 }
 0x68c   :  { %v536_v58 = vrot.slane %v464_v57, 4  ;;  %466 = vrot.lane.b32.xlu2 %v464_v57, %s1533_s27 }
 0x68e   :  { %537 = vrot.lane.b32.xlu1 %v536_v58, %s1533_s27 }
 0x6a8   :  { %v392_v59 = vpop.permute.xlu0 %391 }
 0x6a9   :  { %v394_v41 = vmul.f32 %v392_v59, %v375_v45 }
 0x6ab   :  { %v470_v60 = vrot.slane %v394_v41, 4 }
 0x6ad   :  { %471 = vrot.lane.b32.xlu0 %v470_v60, %s1532_s26 }
 0x6e6   :  { %v467_v63 = vpop.permute.xlu2 %466 }
 0x700   :  { %v538_v62 = vpop.permute.xlu1 %537 }
 0x701   :  { %1288 = vmatmul.msk.f32.vlgmr.msra.gmra.mxu1 %vm122_vm5, %v538_v62 }
 0x702   :  { %1109 = vmatpush.msra.mxu1 %v1586_v0 }
 0x704   :  { %1110 = vmatpush.msra.mxu1 %v1591_v1 }
 0x706   :  { %1111 = vmatpush.msra.mxu1 %v1597_v3 }
 0x708   :  { %1112 = vmatpush.msra.mxu1 %v1607_v6 }
 0x71f   :  { %v472_v2 = vpop.permute.xlu0 %471 }
 0x720   :  { %v474_v4 = vsel %vm122_vm5, %v467_v63, %v472_v2 }
 0x721   :  { %v476_v5 = vrot.slane %v474_v4, 4 }
 0x723   :  { %1286 = vmatmul.msk.f32.vlgmr.msrb.gmra.mxu3 %vm196_vm6, %v476_v5 }
 0x724   :  { %1043 = vmatpush.msrb.mxu3 %v1638_v33 }
 0x726   :  { %1044 = vmatpush.msrb.mxu3 %v1640_v34 }
 0x728   :  { %1045 = vmatpush.msrb.mxu3 %v1644_v35 }
 0x72a   :  { %1046 = vmatpush.msrb.mxu3 %v1649_v36 }
 0x72c   :  { %1047 = vmatpush.msrb.mxu3 %v1654_v37 }
 0x72e   :  { %1048 = vmatpush.msrb.mxu3 %v1659_v38 }
 0x730   :  { %1049 = vmatpush.msrb.mxu3 %v1664_v39 }
 0x732   :  { %1050 = vmatpush.msrb.mxu3 %v1674_v42 }
 0x77e   :  { %v558_v0 = vpop.f32.mrf.mxu1 }
 0x77f   :  { %v562_v1 = vrot.slane %v558_v0, 2 }
 0x781   :  { %v564_v3 = vadd.f32 %v562_v1, %v1623_v8 }
 0x783   :  { %v565_v6 = vadd.f32 %v1628_v9, %v564_v3 }
 0x785   :  { %1360 = vtanh.f32 %v565_v6  ;;  %v1289_v13 = vmul.f32 -1.442695, %v565_v6 }
 0x78b   :  { %v1361_v7 = vpop.eup %1360 }
 0x78c   :  { %591 = vrot.lane.b32.xlu1 %v1361_v7, %s1532_s26 }
 0x7a6   :  { %v496_v10 = vpop.f32.mrf.mxu3 }
 0x7a7   :  { %v497_v11 = vadd.f32 %v1707_v49, %v496_v10 }
 0x7a9   :  { %1362 = vtanh.f32 %v497_v11  ;;  %v1287_v15 = vmul.f32 -1.442695, %v497_v11 }
 0x7aa   :  { %1364 = vpow2.f32 %v1289_v13 }
 0x7ab   :  { %1366 = vpow2.f32 %v1287_v15 }
 0x7af   :  { %v1363_v12 = vpop.eup %1362 }
 0x7b0   :  { %521 = vrot.lane.b32.xlu2 %v1363_v12, %s1532_s26  ;;  %v1365_v14 = vpop.eup %1364 }
 0x7b1   :  { %v569_v16 = vadd.f32 1.0, %v1365_v14  ;;  %v1367_v8 = vpop.eup %1366 }
 0x7b2   :  { %v502_v18 = vadd.f32 1.0, %v1367_v8 }
 0x7b3   :  { %1368 = vrcp.f32 %v569_v16  ;;  %v581_v25 = vand.u32 2147483648, %v569_v16  ;;  %vm575_vm10 = vweird.f32 %v569_v16  ;;  %v579_v26 = vand.u32 2147483647, %v569_v16 }
 0x7b4   :  { %1370 = vrcp.f32 %v502_v18  ;;  %v514_v45 = vand.u32 2147483648, %v502_v18  ;;  %vm508_vm14 = vweird.f32 %v502_v18  ;;  %v512_v46 = vand.u32 2147483647, %v502_v18 }
 0x7b5   :  { %v582_v30 = vor.u32 1.1754944e-38, %v581_v25  ;;  %vm580_vm12 = vcmp.eq.f32.partialorder %v579_v26, 8.507059e+37 }
 0x7b6   :  { %v515_v48 = vor.u32 1.1754944e-38, %v514_v45  ;;  %vm513_vm0 = vcmp.eq.f32.partialorder %v512_v46, 8.507059e+37 }
 0x7b9   :  { %v1369_v17 = vpop.eup %1368 }
 0x7ba   :  { %v571_v19 = vmul.f32 %v1369_v17, %v569_v16  ;;  %v1371_v22 = vpop.eup %1370  ;;  %vm576_vm9 = vweird.f32 %v1369_v17 }
 0x7bb   :  { %v504_v24 = vmul.f32 %v1371_v22, %v502_v18  ;;  %vm577_vm11 = vmor %vm575_vm10, %vm576_vm9  ;;  %vm509_vm13 = vweird.f32 %v1371_v22 }
 0x7bc   :  { %v572_v20 = vsub.f32 1.0, %v571_v19  ;;  %vm510_vm15 = vmor %vm508_vm14, %vm509_vm13 }
 0x7bd   :  { %v505_v28 = vsub.f32 1.0, %v504_v24 }
 0x7be   :  { %v573_v21 = vmul.f32 %v1369_v17, %v572_v20 }
 0x7bf   :  { %v506_v44 = vmul.f32 %v1371_v22, %v505_v28 }
 0x7c0   :  { %v574_v23 = vadd.f32 %v1369_v17, %v573_v21 }
 0x7c1   :  { %v507_v31 = vadd.f32 %v1371_v22, %v506_v44 }
 0x7c2   :  { %v578_v27 = vsel %vm577_vm11, %v1369_v17, %v574_v23 }
 0x7c3   :  { %v583_v40 = vsel %vm580_vm12, %v582_v30, %v578_v27  ;;  %v511_v47 = vsel %vm510_vm15, %v1371_v22, %v507_v31 }
 0x7c4   :  { %v516_v52 = vsel %vm513_vm0, %v515_v48, %v511_v47  ;;  %v589_v56 = vmul.f32 %v587_v55, %v583_v40 }
 0x7c5   :  { %v519_v59 = vmul.f32 %v516_v52, %v1763_v54 }
 0x7fe   :  { %v592_v32 = vpop.permute.xlu1 %591 }
 0x7ff   :  { %v594_v43 = vmul.f32 %v592_v32, %v583_v40 }
 0x801   :  { %596 = vrot.lane.b32.xlu0 %v594_v43, %s1533_s27 }
 0x80a   :  { %v522_v50 = vpop.permute.xlu2 %521 }
 0x80b   :  { %v524_v53 = vmul.f32 %v522_v50, %v516_v52 }
 0x80d   :  { %526 = vrot.lane.b32.xlu1 %v524_v53, %s1533_s27 }
 0x873   :  { %v597_v29 = vpop.permute.xlu0 %596 }
 0x874   :  { %v1794_v57 = vadd.f32 %v597_v29, %v589_v56 }
 0x876   :  { %1372 = vtanh.f32 %v1794_v57  ;;  %v725_v48 = vrot.slane %v1794_v57, 6 }
 0x87c   :  { %v1373_v58 = vpop.eup %1372 }
 0x87d   :  { %602 = vrot.lane.b32.xlu2 %v1373_v58, %s1532_s26 }
 0x87f   :  { %v527_v41 = vpop.permute.xlu1 %526 }
 0x880   :  { %v1799_v60 = vadd.f32 %v527_v41, %v519_v59 }
 0x882   :  { %1374 = vtanh.f32 %v1799_v60 }
 0x888   :  { %v1375_v62 = vpop.eup %1374 }
 0x889   :  { %532 = vrot.lane.b32.xlu0 %v1375_v62, %s1532_s26 }
 0x8d7   :  { %v603_v51 = vpop.permute.xlu2 %602 }
 0x8d8   :  { %v605_v63 = vmul.f32 %v603_v51, %v583_v40 }
 0x8da   :  { %v677_v2 = vrot.slane %v605_v63, 6  ;;  %607 = vrot.lane.b32.xlu2 %v605_v63, %s1533_s27 }
 0x8dc   :  { %678 = vrot.lane.b32.xlu1 %v677_v2, %s1533_s27 }
 0x8fb   :  { %v533_v4 = vpop.permute.xlu0 %532 }
 0x8fc   :  { %v535_v5 = vmul.f32 %v533_v4, %v516_v52 }
 0x8fe   :  { %v611_v0 = vrot.slane %v535_v5, 2 }
 0x900   :  { %612 = vrot.lane.b32.xlu0 %v611_v0, %s1532_s26 }
 0x934   :  { %v608_v1 = vpop.permute.xlu2 %607 }
 0x94e   :  { %v679_v54 = vpop.permute.xlu1 %678 }
 0x94f   :  { %1292 = vmatmul.msk.f32.vlgmr.msra.gmra.mxu0 %vm122_vm5, %v679_v54 }
 0x972   :  { %v613_v3 = vpop.permute.xlu0 %612 }
 0x973   :  { %v615_v6 = vsel %vm122_vm5, %v608_v1, %v613_v3 }
 0x974   :  { %v617_v7 = vrot.slane %v615_v6, 6 }
 0x976   :  { %1290 = vmatmul.msk.f32.vlgmr.msrb.gmra.mxu2 %vm196_vm6, %v617_v7 }
 0x977   :  { %1184 = vmatpush.msrb.mxu2 %v1638_v33 }
 0x979   :  { %1185 = vmatpush.msrb.mxu2 %v1640_v34 }
 0x97b   :  { %1186 = vmatpush.msrb.mxu2 %v1644_v35 }
 0x97d   :  { %1187 = vmatpush.msrb.mxu2 %v1649_v36 }
 0x97f   :  { %1188 = vmatpush.msrb.mxu2 %v1654_v37 }
 0x981   :  { %1189 = vmatpush.msrb.mxu2 %v1659_v38 }
 0x983   :  { %1190 = vmatpush.msrb.mxu2 %v1664_v39 }
 0x985   :  { %1191 = vmatpush.msrb.mxu2 %v1674_v42 }
 0x9cc   :  { %v699_v10 = vpop.f32.mrf.mxu0 }
 0x9cd   :  { %v702_v11 = vadd.f32 %v699_v10, %v1752_v61 }
 0x9cf   :  { %v703_v12 = vadd.f32 %v1628_v9, %v702_v11 }
 0x9d1   :  { %1376 = vtanh.f32 %v703_v12  ;;  %v1293_v37 = vmul.f32 -1.442695, %v703_v12 }
 0x9d7   :  { %v1377_v33 = vpop.eup %1376 }
 0x9d8   :  { %729 = vrot.lane.b32.xlu1 %v1377_v33, %s1532_s26 }
 0x9f9   :  { %v637_v34 = vpop.f32.mrf.mxu2 }
 0x9fa   :  { %v638_v35 = vadd.f32 %v1707_v49, %v637_v34 }
 0x9fc   :  { %1378 = vtanh.f32 %v638_v35  ;;  %v1291_v42 = vmul.f32 -1.442695, %v638_v35 }
 0x9fd   :  { %1380 = vpow2.f32 %v1293_v37 }
 0xa02   :  { %v1379_v36 = vpop.eup %1378 }
 0xa03   :  { %662 = vrot.lane.b32.xlu2 %v1379_v36, %s1532_s26  ;;  %v1381_v38 = vpop.eup %1380 }
 0xa04   :  { %v707_v39 = vadd.f32 1.0, %v1381_v38 }
 0xa06   :  { %1382 = vrcp.f32 %v707_v39  ;;  %v719_v19 = vand.u32 2147483648, %v707_v39  ;;  %vm713_vm2 = vweird.f32 %v707_v39  ;;  %v717_v20 = vand.u32 2147483647, %v707_v39 }
 0xa07   :  { %1384 = vpow2.f32 %v1291_v42 }
 0xa08   :  { %v720_v23 = vor.u32 1.1754944e-38, %v719_v19  ;;  %vm718_vm4 = vcmp.eq.f32.partialorder %v717_v20, 8.507059e+37 }
 0xa0c   :  { %v1383_v13 = vpop.eup %1382 }
 0xa0d   :  { %v709_v14 = vmul.f32 %v1383_v13, %v707_v39  ;;  %v1385_v15 = vpop.eup %1384  ;;  %vm714_vm1 = vweird.f32 %v1383_v13 }
 0xa0e   :  { %v643_v8 = vadd.f32 1.0, %v1385_v15  ;;  %vm715_vm3 = vmor %vm713_vm2, %vm714_vm1 }
 0xa0f   :  { %v710_v16 = vsub.f32 1.0, %v709_v14 }
 0xa10   :  { %1386 = vrcp.f32 %v643_v8  ;;  %v655_v40 = vand.u32 2147483648, %v643_v8  ;;  %vm649_vm8 = vweird.f32 %v643_v8  ;;  %v653_v43 = vand.u32 2147483647, %v643_v8 }
 0xa11   :  { %v711_v17 = vmul.f32 %v1383_v13, %v710_v16 }
 0xa12   :  { %v656_v31 = vor.u32 1.1754944e-38, %v655_v40  ;;  %vm654_vm10 = vcmp.eq.f32.partialorder %v653_v43, 8.507059e+37 }
 0xa13   :  { %v712_v18 = vadd.f32 %v1383_v13, %v711_v17 }
 0xa15   :  { %v716_v22 = vsel %vm715_vm3, %v1383_v13, %v712_v18 }
 0xa16   :  { %v1387_v21 = vpop.eup %1386  ;;  %v721_v25 = vsel %vm718_vm4, %v720_v23, %v716_v22 }
 0xa17   :  { %v645_v26 = vmul.f32 %v1387_v21, %v643_v8  ;;  %vm650_vm7 = vweird.f32 %v1387_v21  ;;  %v727_v50 = vmul.f32 %v725_v48, %v721_v25 }
 0xa18   :  { %vm651_vm9 = vmor %vm649_vm8, %vm650_vm7 }
 0xa19   :  { %v646_v28 = vsub.f32 1.0, %v645_v26 }
 0xa1b   :  { %v647_v30 = vmul.f32 %v1387_v21, %v646_v28 }
 0xa1d   :  { %v648_v32 = vadd.f32 %v1387_v21, %v647_v30 }
 0xa1f   :  { %v652_v44 = vsel %vm651_vm9, %v1387_v21, %v648_v32 }
 0xa20   :  { %v657_v46 = vsel %vm654_vm10, %v656_v31, %v652_v44 }
 0xa21   :  { %v660_v56 = vmul.f32 %v657_v46, %v1799_v60 }
 0xa4a   :  { %v730_v24 = vpop.permute.xlu1 %729 }
 0xa4b   :  { %v732_v27 = vmul.f32 %v730_v24, %v721_v25 }
 0xa4d   :  { %734 = vrot.lane.b32.xlu0 %v732_v27, %s1533_s27 }
 0xa5d   :  { %v663_v45 = vpop.permute.xlu2 %662 }
 0xa5e   :  { %v665_v47 = vmul.f32 %v663_v45, %v657_v46 }
 0xa60   :  { %667 = vrot.lane.b32.xlu1 %v665_v47, %s1533_s27 }
 0xabf   :  { %v735_v52 = vpop.permute.xlu0 %734 }
 0xac0   :  { %v1825_v53 = vadd.f32 %v735_v52, %v727_v50 }
 0xac2   :  { %1388 = vtanh.f32 %v1825_v53  ;;  %v861_v32 = vrot.slane %v1825_v53, 6 }
 0xac8   :  { %v1389_v55 = vpop.eup %1388 }
 0xac9   :  { %740 = vrot.lane.b32.xlu2 %v1389_v55, %s1532_s26 }
 0xad2   :  { %v668_v29 = vpop.permute.xlu1 %667 }
 0xad3   :  { %v1830_v58 = vadd.f32 %v668_v29, %v660_v56 }
 0xad5   :  { %1390 = vtanh.f32 %v1830_v58 }
 0xadb   :  { %v1391_v59 = vpop.eup %1390 }
 0xadc   :  { %673 = vrot.lane.b32.xlu0 %v1391_v59, %s1532_s26 }
 0xb23   :  { %v741_v57 = vpop.permute.xlu2 %740 }
 0xb24   :  { %v743_v41 = vmul.f32 %v741_v57, %v721_v25 }
 0xb26   :  { %745 = vrot.lane.b32.xlu1 %v743_v41, %s1533_s27 }
 0xb4e   :  { %v674_v62 = vpop.permute.xlu0 %673 }
 0xb4f   :  { %v676_v51 = vmul.f32 %v674_v62, %v657_v46 }
 0xb51   :  { %749 = vrot.lane.b32.xlu2 %v676_v51, %s1532_s26 }
 0xb98   :  { %v746_v63 = vpop.permute.xlu1 %745 }
 0xb99   :  { %1296 = vmatmul.msk.f32.vlgmr.msra.gmra.mxu3 %vm122_vm5, %v746_v63 }
 0xbab   :  { %v750_v60 = vpop.permute.xlu2 %749 }
 0xbac   :  { %v752_v2 = vsel %vm122_vm5, %v746_v63, %v750_v60 }
 0xbad   :  { %1294 = vmatmul.msk.f32.vlgmr.msrb.gmra.mxu1 %vm196_vm6, %v752_v2 }
 0xc1c   :  { %v832_v4 = vpop.f32.mrf.mxu3 }
 0xc1d   :  { %v836_v5 = vrot.slane %v832_v4, 6 }
 0xc1f   :  { %v838_v0 = vadd.f32 %v836_v5, %v1752_v61 }
 0xc21   :  { %v839_v54 = vadd.f32 %v1628_v9, %v838_v0  ;;  %v1867_v0 = vld [vmem:[%s1926_s4] ss:$0 sm:$0xff] }
 0xc23   :  { %1392 = vtanh.f32 %v839_v54  ;;  %v1297_v10 = vmul.f32 -1.442695, %v839_v54 }
 0xc29   :  { %v1393_v1 = vpop.eup %1392 }
 0xc2a   :  { %865 = vrot.lane.b32.xlu0 %v1393_v1, %s1532_s26  ;;  %v773_v3 = vpop.f32.mrf.mxu1 }
 0xc2b   :  { %v774_v6 = vadd.f32 %v1707_v49, %v773_v3 }
 0xc2d   :  { %1394 = vtanh.f32 %v774_v6  ;;  %v1295_v12 = vmul.f32 -1.442695, %v774_v6 }
 0xc2e   :  { %1396 = vpow2.f32 %v1297_v10 }
 0xc2f   :  { %1398 = vpow2.f32 %v1295_v12 }
 0xc33   :  { %v1395_v7 = vpop.eup %1394 }
 0xc34   :  { %798 = vrot.lane.b32.xlu1 %v1395_v7, %s1532_s26  ;;  %v1397_v11 = vpop.eup %1396 }
 0xc35   :  { %v843_v33 = vadd.f32 1.0, %v1397_v11  ;;  %v1399_v34 = vpop.eup %1398 }
 0xc36   :  { %v779_v35 = vadd.f32 1.0, %v1399_v34 }
 0xc37   :  { %1400 = vrcp.f32 %v843_v33  ;;  %v855_v14 = vand.u32 2147483648, %v843_v33  ;;  %vm849_vm12 = vweird.f32 %v843_v33  ;;  %v853_v15 = vand.u32 2147483647, %v843_v33 }
 0xc38   :  { %1402 = vrcp.f32 %v779_v35  ;;  %v791_v23 = vand.u32 2147483648, %v779_v35  ;;  %vm785_vm0 = vweird.f32 %v779_v35  ;;  %v789_v24 = vand.u32 2147483647, %v779_v35 }
 0xc39   :  { %v856_v17 = vor.u32 1.1754944e-38, %v855_v14  ;;  %vm854_vm14 = vcmp.eq.f32.partialorder %v853_v15, 8.507059e+37 }
 0xc3a   :  { %v792_v26 = vor.u32 1.1754944e-38, %v791_v23  ;;  %vm790_vm2 = vcmp.eq.f32.partialorder %v789_v24, 8.507059e+37 }
 0xc3d   :  { %v1401_v9 = vpop.eup %1400 }
 0xc3e   :  { %v845_v36 = vmul.f32 %v1401_v9, %v843_v33  ;;  %v1403_v38 = vpop.eup %1402  ;;  %vm850_vm11 = vweird.f32 %v1401_v9 }
 0xc3f   :  { %v781_v42 = vmul.f32 %v1403_v38, %v779_v35  ;;  %vm851_vm13 = vmor %vm849_vm12, %vm850_vm11  ;;  %vm786_vm15 = vweird.f32 %v1403_v38 }
 0xc40   :  { %v846_v37 = vsub.f32 1.0, %v845_v36  ;;  %vm787_vm1 = vmor %vm785_vm0, %vm786_vm15 }
 0xc41   :  { %v782_v16 = vsub.f32 1.0, %v781_v42 }
 0xc42   :  { %v847_v39 = vmul.f32 %v1401_v9, %v846_v37 }
 0xc43   :  { %v783_v18 = vmul.f32 %v1403_v38, %v782_v16 }
 0xc44   :  { %v848_v13 = vadd.f32 %v1401_v9, %v847_v39 }
 0xc45   :  { %v784_v22 = vadd.f32 %v1403_v38, %v783_v18 }
 0xc46   :  { %v852_v8 = vsel %vm851_vm13, %v1401_v9, %v848_v13 }
 0xc47   :  { %v857_v19 = vsel %vm854_vm14, %v856_v17, %v852_v8  ;;  %v788_v25 = vsel %vm787_vm1, %v1403_v38, %v784_v22 }
 0xc48   :  { %v793_v28 = vsel %vm790_vm2, %v792_v26, %v788_v25  ;;  %v863_v40 = vmul.f32 %v861_v32, %v857_v19 }
 0xc49   :  { %v796_v45 = vmul.f32 %v793_v28, %v1830_v58 }
 0xc9c   :  { %v866_v20 = vpop.permute.xlu0 %865 }
 0xc9d   :  { %v868_v21 = vmul.f32 %v866_v20, %v857_v19 }
 0xc9f   :  { %870 = vrot.lane.b32.xlu2 %v868_v21, %s1533_s27 }
 0xca6   :  { %v799_v27 = vpop.permute.xlu1 %798 }
 0xca7   :  { %v801_v30 = vmul.f32 %v799_v27, %v793_v28 }
 0xca9   :  { %803 = vrot.lane.b32.xlu0 %v801_v30, %s1533_s27 }
 0xcf9   :  { %v871_v43 = vpop.permute.xlu2 %870 }
 0xcfa   :  { %v1847_v44 = vadd.f32 %v871_v43, %v863_v40 }
 0xcfc   :  { %1404 = vtanh.f32 %v1847_v44  ;;  %v1002_v32 = vrot.slane %v1847_v44, 6 }
 0xd02   :  { %v1405_v31 = vpop.eup %1404 }
 0xd03   :  { %876 = vrot.lane.b32.xlu1 %v1405_v31, %s1532_s26 }
 0xd1b   :  { %v804_v46 = vpop.permute.xlu0 %803 }
 0xd1c   :  { %v1852_v47 = vadd.f32 %v804_v46, %v796_v45 }
 0xd1e   :  { %1406 = vtanh.f32 %v1852_v47 }
 0xd24   :  { %v1407_v48 = vpop.eup %1406 }
 0xd25   :  { %809 = vrot.lane.b32.xlu2 %v1407_v48, %s1532_s26 }
 0xd75   :  { %v877_v50 = vpop.permute.xlu1 %876 }
 0xd76   :  { %v879_v52 = vmul.f32 %v877_v50, %v857_v19 }
 0xd78   :  { %v951_v53 = vrot.slane %v879_v52, 2  ;;  %881 = vrot.lane.b32.xlu1 %v879_v52, %s1533_s27 }
 0xd7a   :  { %952 = vrot.lane.b32.xlu0 %v951_v53, %s1533_s27 }
 0xd7f   :  { %v810_v55 = vpop.permute.xlu2 %809 }
 0xd80   :  { %v812_v56 = vmul.f32 %v810_v55, %v793_v28 }
 0xd82   :  { %v885_v29 = vrot.slane %v812_v56, 6 }
 0xd84   :  { %886 = vrot.lane.b32.xlu2 %v885_v29, %s1532_s26 }
 0xdde   :  { %v887_v58 = vpop.permute.xlu2 %886 }
 0xdea   :  { %v882_v59 = vpop.permute.xlu1 %881 }
 0xdeb   :  { %v889_v57 = vsel %vm122_vm5, %v882_v59, %v887_v58 }
 0xdec   :  { %v891_v41 = vrot.slane %v889_v57, 2  ;;  %v953_v62 = vpop.permute.xlu0 %952 }
 0xded   :  { %1300 = vmatmul.msk.f32.vlgmr.msra.gmra.mxu2 %vm122_vm5, %v953_v62 }
 0xdee   :  { %1298 = vmatmul.msk.f32.vlgmr.msrb.gmra.mxu0 %vm196_vm6, %v891_v41 }
 0xe6b   :  { %v911_v51 = vpop.f32.mrf.mxu0 }
 0xe6c   :  { %v912_v63 = vadd.f32 %v1707_v49, %v911_v51 }
 0xe6e   :  { %1408 = vtanh.f32 %v912_v63  ;;  %v1299_v49 = vmul.f32 -1.442695, %v912_v63 }
 0xe70   :  { %v973_v60 = vpop.f32.mrf.mxu2 }
 0xe71   :  { %v977_v2 = vrot.slane %v973_v60, 4  ;;  %v1896_v60 = vld [vmem:[%s1926_s4 + $0x1] ss:$0 sm:$0xff] }
 0xe73   :  { %v979_v4 = vadd.f32 %v977_v2, %v1752_v61 }
 0xe74   :  { %v1409_v5 = vpop.eup %1408 }
 0xe75   :  { %v980_v54 = vadd.f32 %v1867_v0, %v979_v4  ;;  %936 = vrot.lane.b32.xlu0 %v1409_v5, %s1532_s26 }
 0xe77   :  { %1410 = vtanh.f32 %v980_v54  ;;  %v1301_v3 = vmul.f32 -1.442695, %v980_v54 }
 0xe78   :  { %1412 = vpow2.f32 %v1299_v49 }
 0xe79   :  { %1414 = vpow2.f32 %v1301_v3 }
 0xe7d   :  { %v1411_v1 = vpop.eup %1410 }
 0xe7e   :  { %1006 = vrot.lane.b32.xlu1 %v1411_v1, %s1532_s26  ;;  %v1413_v6 = vpop.eup %1412 }
 0xe7f   :  { %v917_v7 = vadd.f32 1.0, %v1413_v6  ;;  %v1415_v10 = vpop.eup %1414 }
 0xe80   :  { %v984_v11 = vadd.f32 1.0, %v1415_v10 }
 0xe81   :  { %1416 = vrcp.f32 %v917_v7  ;;  %v929_v38 = vand.u32 2147483648, %v917_v7  ;;  %vm923_vm4 = vweird.f32 %v917_v7  ;;  %v927_v42 = vand.u32 2147483647, %v917_v7 }
 0xe82   :  { %1418 = vrcp.f32 %v984_v11  ;;  %v996_v19 = vand.u32 2147483648, %v984_v11  ;;  %vm990_vm10 = vweird.f32 %v984_v11  ;;  %v994_v20 = vand.u32 2147483647, %v984_v11 }
 0xe83   :  { %v930_v14 = vor.u32 1.1754944e-38, %v929_v38  ;;  %vm928_vm8 = vcmp.eq.f32.partialorder %v927_v42, 8.507059e+37 }
 0xe84   :  { %v997_v22 = vor.u32 1.1754944e-38, %v996_v19  ;;  %vm995_vm12 = vcmp.eq.f32.partialorder %v994_v20, 8.507059e+37 }
 0xe87   :  { %v1417_v12 = vpop.eup %1416 }
 0xe88   :  { %v919_v33 = vmul.f32 %v1417_v12, %v917_v7  ;;  %v1419_v9 = vpop.eup %1418  ;;  %vm924_vm3 = vweird.f32 %v1417_v12 }
 0xe89   :  { %v986_v36 = vmul.f32 %v1419_v9, %v984_v11  ;;  %vm925_vm7 = vmor %vm923_vm4, %vm924_vm3  ;;  %vm991_vm9 = vweird.f32 %v1419_v9 }
 0xe8a   :  { %v920_v34 = vsub.f32 1.0, %v919_v33  ;;  %vm992_vm11 = vmor %vm990_vm10, %vm991_vm9 }
 0xe8b   :  { %v987_v39 = vsub.f32 1.0, %v986_v36 }
 0xe8c   :  { %v921_v35 = vmul.f32 %v1417_v12, %v920_v34 }
 0xe8d   :  { %v988_v15 = vmul.f32 %v1419_v9, %v987_v39 }
 0xe8e   :  { %v922_v37 = vadd.f32 %v1417_v12, %v921_v35 }
 0xe8f   :  { %v989_v18 = vadd.f32 %v1419_v9, %v988_v15 }
 0xe90   :  { %v926_v13 = vsel %vm925_vm7, %v1417_v12, %v922_v37 }
 0xe91   :  { %v931_v16 = vsel %vm928_vm8, %v930_v14, %v926_v13  ;;  %v993_v21 = vsel %vm992_vm11, %v1419_v9, %v989_v18 }
 0xe92   :  { %v998_v24 = vsel %vm995_vm12, %v997_v22, %v993_v21  ;;  %v934_v26 = vmul.f32 %v931_v16, %v1852_v47 }
 0xe93   :  { %v1004_v40 = vmul.f32 %v1002_v32, %v998_v24 }
 0xee7   :  { %v937_v8 = vpop.permute.xlu0 %936 }
 0xee8   :  { %v939_v17 = vmul.f32 %v937_v8, %v931_v16 }
 0xeea   :  { %941 = vrot.lane.b32.xlu2 %v939_v17, %s1533_s27 }
 0xef0   :  { %v1007_v23 = vpop.permute.xlu1 %1006 }
 0xef1   :  { %v1009_v25 = vmul.f32 %v1007_v23, %v998_v24 }
 0xef3   :  { %1011 = vrot.lane.b32.xlu0 %v1009_v25, %s1533_s27 }
 0xf44   :  { %v942_v27 = vpop.permute.xlu2 %941 }
 0xf45   :  { %v1875_v28 = vadd.f32 %v942_v27, %v934_v26 }
 0xf47   :  { %1420 = vtanh.f32 %v1875_v28 }
 0xf4d   :  { %v1421_v30 = vpop.eup %1420 }
 0xf4e   :  { %947 = vrot.lane.b32.xlu1 %v1421_v30, %s1532_s26 }
 0xf65   :  { %v1012_v43 = vpop.permute.xlu0 %1011 }
 0xf66   :  { %v1880_v31 = vadd.f32 %v1012_v43, %v1004_v40 }
 0xf68   :  { %1422 = vtanh.f32 %v1880_v31  ;;  %v1143_v21 = vrot.slane %v1880_v31, 6 }
 0xf6e   :  { %v1423_v45 = vpop.eup %1422 }
 0xf6f   :  { %1017 = vrot.lane.b32.xlu2 %v1423_v45, %s1532_s26 }
 0xfc0   :  { %v948_v46 = vpop.permute.xlu1 %947 }
 0xfc1   :  { %v950_v47 = vmul.f32 %v948_v46, %v931_v16 }
 0xfc3   :  { %v1026_v48 = vrot.slane %v950_v47, 4 }
 0xfc5   :  { %1027 = vrot.lane.b32.xlu1 %v1026_v48, %s1532_s26 }
 0xfc9   :  { %v1018_v50 = vpop.permute.xlu2 %1017 }
 0xfca   :  { %v1020_v52 = vmul.f32 %v1018_v50, %v998_v24 }
 0xfcc   :  { %v1092_v53 = vrot.slane %v1020_v52, 4  ;;  %1022 = vrot.lane.b32.xlu0 %v1020_v52, %s1533_s27 }
 0xfce   :  { %1093 = vrot.lane.b32.xlu2 %v1092_v53, %s1533_s27 }
0x1028   :  { %v1094_v44 = vpop.permute.xlu2 %1093 }
0x1029   :  { %1304 = vmatmul.msk.f32.vlgmr.msra.gmra.mxu1 %vm122_vm5, %v1094_v44 }
0x1037   :  { %v1028_v55 = vpop.permute.xlu1 %1027 }
0x103e   :  { %v1023_v56 = vpop.permute.xlu0 %1022 }
0x103f   :  { %v1030_v29 = vsel %vm122_vm5, %v1023_v56, %v1028_v55 }
0x1040   :  { %v1032_v58 = vrot.slane %v1030_v29, 4 }
0x1042   :  { %1302 = vmatmul.msk.f32.vlgmr.msrb.gmra.mxu3 %vm196_vm6, %v1032_v58 }
0x10a6   :  { %v1114_v59 = vpop.f32.mrf.mxu1 }
0x10a7   :  { %v1118_v57 = vrot.slane %v1114_v59, 2 }
0x10a9   :  { %v1120_v41 = vadd.f32 %v1118_v57, %v1752_v61 }
0x10ab   :  { %v1121_v62 = vadd.f32 %v1867_v0, %v1120_v41 }
0x10ad   :  { %1424 = vtanh.f32 %v1121_v62  ;;  %v1305_v5 = vmul.f32 -1.442695, %v1121_v62 }
0x10b3   :  { %v1425_v51 = vpop.eup %1424 }
0x10b4   :  { %1147 = vrot.lane.b32.xlu1 %v1425_v51, %s1532_s26 }
0x10c5   :  { %v1052_v63 = vpop.f32.mrf.mxu3 }
0x10c6   :  { %v1053_v2 = vadd.f32 %v1896_v60, %v1052_v63 }
0x10c8   :  { %1426 = vtanh.f32 %v1053_v2  ;;  %v1303_v49 = vmul.f32 -1.442695, %v1053_v2 }
0x10c9   :  { %1428 = vpow2.f32 %v1305_v5 }
0x10ce   :  { %v1427_v4 = vpop.eup %1426 }
0x10cf   :  { %1077 = vrot.lane.b32.xlu0 %v1427_v4, %s1532_s26  ;;  %v1429_v61 = vpop.eup %1428 }
0x10d0   :  { %v1125_v0 = vadd.f32 1.0, %v1429_v61 }
0x10d2   :  { %1430 = vrcp.f32 %v1125_v0  ;;  %v1137_v11 = vand.u32 2147483648, %v1125_v0  ;;  %vm1131_vm14 = vweird.f32 %v1125_v0  ;;  %v1135_v33 = vand.u32 2147483647, %v1125_v0 }
0x10d3   :  { %1432 = vpow2.f32 %v1303_v49 }
0x10d4   :  { %v1138_v9 = vor.u32 1.1754944e-38, %v1137_v11  ;;  %vm1136_vm0 = vcmp.eq.f32.partialorder %v1135_v33, 8.507059e+37 }
0x10d8   :  { %v1431_v54 = vpop.eup %1430 }
0x10d9   :  { %v1127_v1 = vmul.f32 %v1431_v54, %v1125_v0  ;;  %v1433_v7 = vpop.eup %1432  ;;  %vm1132_vm13 = vweird.f32 %v1431_v54 }
0x10da   :  { %v1058_v12 = vadd.f32 1.0, %v1433_v7  ;;  %vm1133_vm15 = vmor %vm1131_vm14, %vm1132_vm13  ;;  %v1235_v7 = vld [vmem:[#allocation6 + $0x8] sm:$0xff] }
0x10db   :  { %v1128_v3 = vsub.f32 1.0, %v1127_v1 }
0x10dc   :  { %1434 = vrcp.f32 %v1058_v12  ;;  %v1070_v15 = vand.u32 2147483648, %v1058_v12  ;;  %vm1064_vm2 = vweird.f32 %v1058_v12  ;;  %v1068_v16 = vand.u32 2147483647, %v1058_v12 }
0x10dd   :  { %v1129_v6 = vmul.f32 %v1431_v54, %v1128_v3  ;;  %v1237_v3 = vld [vmem:[#allocation6 + $0x18] sm:$0xff] }
0x10de   :  { %v1071_v17 = vor.u32 1.1754944e-38, %v1070_v15  ;;  %vm1069_vm4 = vcmp.eq.f32.partialorder %v1068_v16, 8.507059e+37  ;;  %1259 = vmatpush.msra.mxu0 %v1237_v3 }
0x10df   :  { %v1130_v10 = vadd.f32 %v1431_v54, %v1129_v6  ;;  %v1236_v6 = vld [vmem:[#allocation6 + $0x10] sm:$0xff] }
0x10e0   :  { %1260 = vmatpush.msra.mxu0 %v1236_v6 }
0x10e1   :  { %v1134_v34 = vsel %vm1133_vm15, %v1431_v54, %v1130_v10  ;;  %v1234_v10 = vld [vmem:[#allocation6] sm:$0xff] }
0x10e2   :  { %v1139_v36 = vsel %vm1136_vm0, %v1138_v9, %v1134_v34  ;;  %v1435_v38 = vpop.eup %1434  ;;  %1261 = vmatpush.msra.mxu0 %v1235_v7  ;;  %v1319_v9 = vld [vmem:[%s1928_s6] ss:$0 sm:$0xff] }
0x10e3   :  { %v1060_v39 = vmul.f32 %v1435_v38, %v1058_v12  ;;  %vm1065_vm1 = vweird.f32 %v1435_v38  ;;  %v1145_v22 = vmul.f32 %v1143_v21, %v1139_v36 }
0x10e4   :  { %vm1066_vm3 = vmor %vm1064_vm2, %vm1065_vm1  ;;  %1262 = vmatpush.msra.mxu0 %v1234_v10 }
0x10e5   :  { %v1061_v42 = vsub.f32 1.0, %v1060_v39 }
0x10e7   :  { %v1062_v13 = vmul.f32 %v1435_v38, %v1061_v42 }
0x10e9   :  { %v1063_v14 = vadd.f32 %v1435_v38, %v1062_v13 }
0x10eb   :  { %v1067_v8 = vsel %vm1066_vm3, %v1435_v38, %v1063_v14 }
0x10ec   :  { %v1072_v19 = vsel %vm1069_vm4, %v1071_v17, %v1067_v8 }
0x10ed   :  { %v1075_v25 = vmul.f32 %v1072_v19, %v1875_v28 }
0x1126   :  { %v1148_v35 = vpop.permute.xlu1 %1147 }
0x1127   :  { %v1150_v37 = vmul.f32 %v1148_v35, %v1139_v36 }
0x1129   :  { %1152 = vrot.lane.b32.xlu0 %v1150_v37, %s1533_s27 }
0x1141   :  { %v1078_v18 = vpop.permute.xlu0 %1077 }
0x1142   :  { %v1080_v20 = vmul.f32 %v1078_v18, %v1072_v19 }
0x1144   :  { %1082 = vrot.lane.b32.xlu2 %v1080_v20, %s1533_s27 }
0x119b   :  { %v1153_v23 = vpop.permute.xlu0 %1152 }
0x119c   :  { %v1155_v24 = vadd.f32 %v1153_v23, %v1145_v22 }
0x119e   :  { %1436 = vtanh.f32 %v1155_v24  ;;  %v1083_v26 = vpop.permute.xlu2 %1082 }
0x119f   :  { %v1085_v27 = vadd.f32 %v1083_v26, %v1075_v25 }
0x11a1   :  { %1438 = vtanh.f32 %v1085_v27 }
0x11a4   :  { %v1437_v30 = vpop.eup %1436 }
0x11a5   :  { %1158 = vrot.lane.b32.xlu2 %v1437_v30, %s1532_s26 }
0x11a7   :  { %v1439_v32 = vpop.eup %1438 }
0x11a8   :  { %1088 = vrot.lane.b32.xlu1 %v1439_v32, %s1532_s26 }
0x11ff   :  { %v1159_v40 = vpop.permute.xlu2 %1158 }
0x1200   :  { %v1161_v43 = vmul.f32 %v1159_v40, %v1139_v36 }
0x1202   :  { %1163 = vrot.lane.b32.xlu0 %v1161_v43, %s1533_s27 }
0x121a   :  { %v1089_v31 = vpop.permute.xlu1 %1088 }
0x121b   :  { %v1091_v45 = vmul.f32 %v1089_v31, %v1072_v19 }
0x121d   :  { %v1167_v46 = vrot.slane %v1091_v45, 2 }
0x121f   :  { %1168 = vrot.lane.b32.xlu1 %v1167_v46, %s1532_s26 }
0x1274   :  { %v1164_v28 = vpop.permute.xlu0 %1163 }
0x1291   :  { %v1169_v47 = vpop.permute.xlu1 %1168 }
0x1292   :  { %v1171_v48 = vsel %vm122_vm5, %v1164_v28, %v1169_v47 }
0x1293   :  { %v1173_v50 = vrot.slane %v1171_v48, 6 }
0x1295   :  { %1306 = vmatmul.msk.f32.vlgmr.msrb.gmra.mxu2 %vm196_vm6, %v1173_v50 }
0x1318   :  { %v1193_v52 = vpop.f32.mrf.mxu2 }
0x1319   :  { %v1194_v53 = vadd.f32 %v1896_v60, %v1193_v52 }
0x131b   :  { %1440 = vtanh.f32 %v1194_v53  ;;  %v1307_v55 = vmul.f32 -1.442695, %v1194_v53 }
0x131d   :  { %1442 = vpow2.f32 %v1307_v55 }
0x1321   :  { %v1441_v44 = vpop.eup %1440 }
0x1322   :  { %1218 = vrot.lane.b32.xlu2 %v1441_v44, %s1532_s26 }
0x1323   :  { %v1443_v56 = vpop.eup %1442 }
0x1324   :  { %v1199_v29 = vadd.f32 1.0, %v1443_v56 }
0x1326   :  { %1444 = vrcp.f32 %v1199_v29  ;;  %v1211_v51 = vand.u32 2147483648, %v1199_v29  ;;  %vm1205_vm6 = vweird.f32 %v1199_v29  ;;  %v1209_v63 = vand.u32 2147483647, %v1199_v29 }
0x1328   :  { %v1212_v2 = vor.u32 1.1754944e-38, %v1211_v51  ;;  %vm1210_vm9 = vcmp.eq.f32.partialorder %v1209_v63, 8.507059e+37 }
0x132c   :  { %v1445_v58 = vpop.eup %1444 }
0x132d   :  { %v1201_v59 = vmul.f32 %v1445_v58, %v1199_v29  ;;  %vm1206_vm7 = vweird.f32 %v1445_v58 }
0x132e   :  { %vm1207_vm8 = vmor %vm1205_vm6, %vm1206_vm7 }
0x132f   :  { %v1202_v57 = vsub.f32 1.0, %v1201_v59 }
0x1331   :  { %v1203_v41 = vmul.f32 %v1445_v58, %v1202_v57 }
0x1333   :  { %v1204_v62 = vadd.f32 %v1445_v58, %v1203_v41 }
0x1335   :  { %v1208_v60 = vsel %vm1207_vm8, %v1445_v58, %v1204_v62 }
0x1336   :  { %v1213_v5 = vsel %vm1210_vm9, %v1212_v2, %v1208_v60 }
0x1337   :  { %v1216_v0 = vmul.f32 %v1213_v5, %v1085_v27 }
0x137c   :  { %v1219_v4 = vpop.permute.xlu2 %1218 }
0x137d   :  { %v1221_v61 = vmul.f32 %v1219_v4, %v1213_v5 }
0x137f   :  { %1223 = vrot.lane.b32.xlu0 %v1221_v61, %s1533_s27 }
0x13f1   :  { %v1224_v54 = vpop.permute.xlu0 %1223 }
0x13f2   :  { %v1226_v1 = vadd.f32 %v1224_v54, %v1216_v0 }
0x13f4   :  { %1446 = vtanh.f32 %v1226_v1 }
0x13fa   :  { %v1447_v49 = vpop.eup %1446 }
0x13fb   :  { %1229 = vrot.lane.b32.xlu1 %v1447_v49, %s1532_s26 }
0x146d   :  { %v1230_v11 = vpop.permute.xlu1 %1229 }
0x146e   :  { %v1232_v12 = vmul.f32 %v1230_v11, %v1213_v5 }
0x1470   :  { %v1233_v33 = vmax.f32 %v1232_v12, 0.0 }
0x1472   :  { %1243 = vrot.lane.b32.xlu2 %v1233_v33, %s1533_s27 }
0x14cc   :  { %v1244_v34 = vpop.permute.xlu2 %1243 }
0x14cd   :  { %1308 = vmatmul.msk.f32.vlgmr.msra.gmra.mxu0 %vm122_vm5, %v1244_v34 }
0x154a   :  { %v1264_v35 = vpop.f32.mrf.mxu0 }
0x154b   :  { %v1265_v36 = vadd.f32 %v1319_v9, %v1264_v35 }
0x154d   :  { %1267 = vst [vmem:[%s1929_s7] sm:$0x3] %v1265_v36 }
0x154e   :  { %1272 = vsyncpa [#allocation3], 1 }
0x154f   :  { %1273 = vsyncpa [#allocation5], 1 }

</bundles_post_ra>
